<compile_context>
chip_gen: v6e
topology: v6e:2x2x1
jax: 0.10.0
libtpu: 0.0.40
codegen_flags: <defaults>
</compile_context>

<pallas_src>
import math
from functools import partial

import jax
import jax.numpy as jnp
from jax.experimental import pallas as pl
from jax.experimental.pallas import tpu as pltpu


# --------------------------------- kernel-side helpers -----------------------------------------

def _batch_norm_flat(h, w, b, eps=1e-5):
    # training-mode BatchNorm1d over all (B*N) positions, per feature (two-pass variance,
    # matching nn.BatchNorm1d's biased normalization path).
    mean = jnp.mean(h, axis=0, keepdims=True)                  # (1, D)
    diff = h - mean
    var = jnp.mean(diff * diff, axis=0, keepdims=True)         # (1, D)
    return diff * jax.lax.rsqrt(var + eps) * w + b             # w, b: (1, D)


# ------------------------------------------ kernel ---------------------------------------------

def encoder_kernel(n_layers, n_heads, head_dim, B, N,
                   x_ref, w0_ref, b0_ref,
                   wq_ref, wk_ref, wv_ref, wo_ref,
                   bn1w_ref, bn1b_ref,
                   ffw1_ref, ffb1_ref, ffw2_ref, ffb2_ref,
                   bn2w_ref, bn2b_ref,
                   h_out_ref):
    Hhd = n_heads * head_dim
    BH = B * n_heads

    def split_heads(t):
        # (B*N, H*hd) -> (B*H, N, hd): single relayout so attention is one batched op.
        return (t.reshape(B, N, n_heads, head_dim)
                 .transpose(0, 2, 1, 3)
                 .reshape(BH, N, head_dim))

    x = x_ref[...]                                             # (B*N, input_dim)

    # init_embed: single 2-D matmul (B*N, input_dim) x (input_dim, D)
    h = jnp.dot(x, w0_ref[...], preferred_element_type=jnp.float32) + b0_ref[...]

    for l in range(n_layers):                                  # static unroll over layers
        # ---- per-role projections: three lane-dense 2-D matmuls (no unaligned column slices) --
        # (1/sqrt(head_dim) is already folded into W_q at trace time)
        q = split_heads(jnp.dot(h, wq_ref[l], preferred_element_type=jnp.float32))
        k = split_heads(jnp.dot(h, wk_ref[l], preferred_element_type=jnp.float32))
        v = split_heads(jnp.dot(h, wv_ref[l], preferred_element_type=jnp.float32))

        # ---- batched attention over the merged (B*H) batch dim --------------------------------
        s = jnp.einsum('bnk,bmk->bnm', q, k,
                       preferred_element_type=jnp.float32)     # (B*H, N, N)
        s = s - jnp.max(s, axis=-1, keepdims=True)
        p = jnp.exp(s)
        attn = p / jnp.sum(p, axis=-1, keepdims=True)          # exact normalization
        o = jnp.einsum('bnm,bmk->bnk', attn, v,
                       preferred_element_type=jnp.float32)     # (B*H, N, hd)
        ho = (o.reshape(B, n_heads, N, head_dim)
               .transpose(0, 2, 1, 3)
               .reshape(B * N, Hhd))                           # (B*N, H*hd)

        # ---- output projection: one (B*N, H*hd) x (H*hd, D) matmul ----------------------------
        mha = jnp.dot(ho, wo_ref[l], preferred_element_type=jnp.float32)
        h = _batch_norm_flat(h + mha, bn1w_ref[l], bn1b_ref[l])

        # ---- feed-forward block: two 2-D matmuls ----------------------------------------------
        ff = jnp.dot(h, ffw1_ref[l], preferred_element_type=jnp.float32) + ffb1_ref[l]
        ff = jnp.maximum(ff, 0.0)
        ff = jnp.dot(ff, ffw2_ref[l], preferred_element_type=jnp.float32) + ffb2_ref[l]
        h = _batch_norm_flat(h + ff, bn2w_ref[l], bn2b_ref[l])

    h_out_ref[...] = h                                         # (B*N, D)


def encoder_forward(x, params, *, n_layers, n_heads, embedding_dim):
    head_dim = embedding_dim // n_heads
    B, N, input_dim = x.shape
    (w0, b0, wq, wk, wv, wo, bn1w, bn1b, ffw1, ffb1, ffw2, ffb2, bn2w, bn2b) = params

    # -------- trace-time weight restructuring: lane-dense, MXU-friendly layouts ----------------
    scale = 1.0 / math.sqrt(head_dim)

    def heads_to_cols(w):                                      # (L, H, D, hd) -> (L, D, H*hd)
        L, H, D, hd = w.shape
        return jnp.transpose(w, (0, 2, 1, 3)).reshape(L, D, H * hd)

    wq_cols = heads_to_cols(wq * scale)                        # fold 1/sqrt(hd) into W_q
    wk_cols = heads_to_cols(wk)
    wv_cols = heads_to_cols(wv)
    wo_flat = wo.reshape(n_layers, n_heads * head_dim, embedding_dim)   # (L, H*hd, D)

    x_flat = x.reshape(B * N, input_dim)                       # flatten once, outside the kernel

    args = (x_flat, w0, b0, wq_cols, wk_cols, wv_cols, wo_flat,
            bn1w, bn1b, ffw1, ffb1, ffw2, ffb2, bn2w, bn2b)
    kernel = partial(encoder_kernel, n_layers, n_heads, head_dim, B, N)
    vmem = lambda: pl.BlockSpec(memory_space=pltpu.MemorySpace.VMEM)

    h_flat = pl.pallas_call(
        kernel,
        out_shape=jax.ShapeDtypeStruct((B * N, embedding_dim), jnp.float32),
        in_specs=[vmem() for _ in args],
        out_specs=vmem(),
        compiler_params=pltpu.CompilerParams(vmem_limit_bytes=64 * 1024 * 1024),
    )(*args)

    h = h_flat.reshape(B, N, embedding_dim)                    # free layout op in XLA
    return h, jnp.mean(h, axis=1)                              # h.mean(dim=1) in the wrapper


# ------------------------------- params + pure-JAX reference -----------------------------------

def init_params(key, input_dim, n_heads, embedding_dim, n_layers, hidden_dim):
    hd = embedding_dim // n_heads
    ks = jax.random.split(key, 8)

    def u(k, shape, fan):
        bound = 1.0 / math.sqrt(fan)
        return jax.random.uniform(k, shape, jnp.float32, -bound, bound)

    w0 = u(ks[0], (input_dim, embedding_dim), input_dim)
    b0 = u(ks[1], (1, embedding_dim), input_dim)
    wq = u(ks[2], (n_layers, n_heads, embedding_dim, hd), embedding_dim)
    wk = u(ks[3], (n_layers, n_heads, embedding_dim, hd), embedding_dim)
    wv = u(ks[4], (n_layers, n_heads, embedding_dim, hd), embedding_dim)
    wo = u(ks[5], (n_layers, n_heads, hd, embedding_dim), hd)
    bn1w = jnp.ones((n_layers, 1, embedding_dim), jnp.float32)
    bn1b = jnp.zeros((n_layers, 1, embedding_dim), jnp.float32)
    ffw1 = u(ks[6], (n_layers, embedding_dim, hidden_dim), embedding_dim)
    ffb1 = jnp.zeros((n_layers, 1, hidden_dim), jnp.float32)
    ffw2 = u(ks[7], (n_layers, hidden_dim, embedding_dim), hidden_dim)
    ffb2 = jnp.zeros((n_layers, 1, embedding_dim), jnp.float32)
    bn2w = jnp.ones((n_layers, 1, embedding_dim), jnp.float32)
    bn2b = jnp.zeros((n_layers, 1, embedding_dim), jnp.float32)
    return (w0, b0, wq, wk, wv, wo, bn1w, bn1b,
            ffw1, ffb1, ffw2, ffb2, bn2w, bn2b)


def _ref_batch_norm(h, w, b, eps=1e-5):
    mean = jnp.mean(h, axis=(0, 1), keepdims=True)
    var = jnp.mean((h - mean) ** 2, axis=(0, 1), keepdims=True)
    return (h - mean) * jax.lax.rsqrt(var + eps) * w[None] + b[None]


def _ref_mha(h, wq, wk, wv, wo, n_heads, head_dim):
    scale = 1.0 / math.sqrt(head_dim)
    out = jnp.zeros_like(h)
    for i in range(n_heads):
        q = jnp.einsum('bnd,dk->bnk', h, wq[i])
        k = jnp.einsum('bnd,dk->bnk', h, wk[i])
        v = jnp.einsum('bnd,dk->bnk', h, wv[i])
        s = jnp.einsum('bnk,bmk->bnm', q, k) * scale
        attn = jax.nn.softmax(s, axis=-1)
        ho = jnp.einsum('bnm,bmk->bnk', attn, v)
        out = out + jnp.einsum('bnk,kd->bnd', ho, wo[i])
    return out


def encoder_reference(x, params, *, n_layers, n_heads, embedding_dim):
    (w0, b0, wq, wk, wv, wo, bn1w, bn1b, ffw1, ffb1, ffw2, ffb2, bn2w, bn2b) = params
    hd = embedding_dim // n_heads
    h = jnp.einsum('bni,id->bnd', x, w0) + b0[None]
    for l in range(n_layers):
        h = h + _ref_mha(h, wq[l], wk[l], wv[l], wo[l], n_heads, hd)
        h = _ref_batch_norm(h, bn1w[l], bn1b[l])
        ff = jnp.maximum(jnp.einsum('bnd,dh->bnh', h, ffw1[l]) + ffb1[l][None], 0.0)
        ff = jnp.einsum('bnh,hd->bnd', ff, ffw2[l]) + ffb2[l][None]
        h = _ref_batch_norm(h + ff, bn2w[l], bn2b[l])
    return h, jnp.mean(h, axis=1)


# -------------------------------------------- main ----------------------------------------------

if __name__ == "__main__":
    input_dim, n_heads, embedding_dim, n_layers, hidden_dim = 4, 4, 32, 2, 64
    B, N = 2, 8

    key = jax.random.PRNGKey(0)
    k_x, k_p = jax.random.split(key)
    x = jax.random.normal(k_x, (B, N, input_dim), jnp.float32)
    params = init_params(k_p, input_dim, n_heads, embedding_dim, n_layers, hidden_dim)

    h, h_mean = encoder_forward(x, params, n_layers=n_layers, n_heads=n_heads,
                                embedding_dim=embedding_dim)
    jax.block_until_ready((h, h_mean))

    h_ref, h_mean_ref = encoder_reference(x, params, n_layers=n_layers, n_heads=n_heads,
                                          embedding_dim=embedding_dim)
    assert h.shape == (B, N, embedding_dim) and h_mean.shape == (B, embedding_dim)
    # Kernel math is now exact (plain softmax divide, two-pass BN stats, f32 throughout), so
    # the only deviations are f32 reduction-order effects (~1e-6).
    assert jnp.allclose(h, h_ref, atol=1e-3, rtol=1e-3)
    assert jnp.allclose(h_mean, h_mean_ref, atol=1e-3, rtol=1e-3)
    print("KERNEL_OK")
</pallas_src>

<mosaic_0001>
module attributes {stable_mosaic.version = 11 : i64} {
  func.func @encoder_kernel(%arg0: memref<16x4xf32, #tpu.memory_space<vmem>>, %arg1: memref<4x32xf32, #tpu.memory_space<vmem>>, %arg2: memref<1x32xf32, #tpu.memory_space<vmem>>, %arg3: memref<2x32x32xf32, #tpu.memory_space<vmem>>, %arg4: memref<2x32x32xf32, #tpu.memory_space<vmem>>, %arg5: memref<2x32x32xf32, #tpu.memory_space<vmem>>, %arg6: memref<2x32x32xf32, #tpu.memory_space<vmem>>, %arg7: memref<2x1x32xf32, #tpu.memory_space<vmem>>, %arg8: memref<2x1x32xf32, #tpu.memory_space<vmem>>, %arg9: memref<2x32x64xf32, #tpu.memory_space<vmem>>, %arg10: memref<2x1x64xf32, #tpu.memory_space<vmem>>, %arg11: memref<2x64x32xf32, #tpu.memory_space<vmem>>, %arg12: memref<2x1x32xf32, #tpu.memory_space<vmem>>, %arg13: memref<2x1x32xf32, #tpu.memory_space<vmem>>, %arg14: memref<2x1x32xf32, #tpu.memory_space<vmem>>, %arg15: memref<16x32xf32, #tpu.memory_space<vmem>>) attributes {dimension_semantics = [], scalar_prefetch = 0 : i64, scratch_operands = 0 : i64, tpu.core_type = #tpu.core_type<tc>} {
    %c0 = arith.constant 0 : index
    %c0_0 = arith.constant 0 : index
    %0 = vector.load %arg0[%c0, %c0_0] : memref<16x4xf32, #tpu.memory_space<vmem>>, vector<16x4xf32>
    %c0_1 = arith.constant 0 : index
    %c0_2 = arith.constant 0 : index
    %1 = vector.load %arg1[%c0_1, %c0_2] : memref<4x32xf32, #tpu.memory_space<vmem>>, vector<4x32xf32>
    %cst = arith.constant dense<0.000000e+00> : vector<16x32xf32>
    %2 = tpu.matmul %0, %1, %cst {dimension_numbers = #tpu.dot_dimension_numbers<[1], [0], [0], [1], [0, 0, 1, 1], [], []>} : vector<16x4xf32>, vector<4x32xf32>, vector<16x32xf32> -> vector<16x32xf32>
    %c0_3 = arith.constant 0 : index
    %c0_4 = arith.constant 0 : index
    %3 = vector.load %arg2[%c0_3, %c0_4] : memref<1x32xf32, #tpu.memory_space<vmem>>, vector<1x32xf32>
    %4 = vector.broadcast %3 : vector<1x32xf32> to vector<16x32xf32>
    %5 = arith.addf %2, %4 : vector<16x32xf32>
    %c0_5 = arith.constant 0 : index
    %c0_6 = arith.constant 0 : index
    %c0_7 = arith.constant 0 : index
    %6 = vector.load %arg3[%c0_5, %c0_6, %c0_7] : memref<2x32x32xf32, #tpu.memory_space<vmem>>, vector<1x32x32xf32>
    %7 = vector.shape_cast %6 : vector<1x32x32xf32> to vector<32x32xf32>
    %cst_8 = arith.constant dense<0.000000e+00> : vector<16x32xf32>
    %8 = tpu.matmul %5, %7, %cst_8 {dimension_numbers = #tpu.dot_dimension_numbers<[1], [0], [0], [1], [0, 0, 1, 1], [], []>} : vector<16x32xf32>, vector<32x32xf32>, vector<16x32xf32> -> vector<16x32xf32>
    %9 = vector.shape_cast %8 : vector<16x32xf32> to vector<2x8x4x8xf32>
    %10 = tpu.transpose %9, [0, 2, 1, 3] : vector<2x8x4x8xf32> -> vector<2x4x8x8xf32>
    %11 = vector.shape_cast %10 : vector<2x4x8x8xf32> to vector<8x8x8xf32>
    %c0_9 = arith.constant 0 : index
    %c0_10 = arith.constant 0 : index
    %c0_11 = arith.constant 0 : index
    %12 = vector.load %arg4[%c0_9, %c0_10, %c0_11] : memref<2x32x32xf32, #tpu.memory_space<vmem>>, vector<1x32x32xf32>
    %13 = vector.shape_cast %12 : vector<1x32x32xf32> to vector<32x32xf32>
    %cst_12 = arith.constant dense<0.000000e+00> : vector<16x32xf32>
    %14 = tpu.matmul %5, %13, %cst_12 {dimension_numbers = #tpu.dot_dimension_numbers<[1], [0], [0], [1], [0, 0, 1, 1], [], []>} : vector<16x32xf32>, vector<32x32xf32>, vector<16x32xf32> -> vector<16x32xf32>
    %15 = vector.shape_cast %14 : vector<16x32xf32> to vector<2x8x4x8xf32>
    %16 = tpu.transpose %15, [0, 2, 1, 3] : vector<2x8x4x8xf32> -> vector<2x4x8x8xf32>
    %17 = vector.shape_cast %16 : vector<2x4x8x8xf32> to vector<8x8x8xf32>
    %c0_13 = arith.constant 0 : index
    %c0_14 = arith.constant 0 : index
    %c0_15 = arith.constant 0 : index
    %18 = vector.load %arg5[%c0_13, %c0_14, %c0_15] : memref<2x32x32xf32, #tpu.memory_space<vmem>>, vector<1x32x32xf32>
    %19 = vector.shape_cast %18 : vector<1x32x32xf32> to vector<32x32xf32>
    %cst_16 = arith.constant dense<0.000000e+00> : vector<16x32xf32>
    %20 = tpu.matmul %5, %19, %cst_16 {dimension_numbers = #tpu.dot_dimension_numbers<[1], [0], [0], [1], [0, 0, 1, 1], [], []>} : vector<16x32xf32>, vector<32x32xf32>, vector<16x32xf32> -> vector<16x32xf32>
    %21 = vector.shape_cast %20 : vector<16x32xf32> to vector<2x8x4x8xf32>
    %22 = tpu.transpose %21, [0, 2, 1, 3] : vector<2x8x4x8xf32> -> vector<2x4x8x8xf32>
    %23 = vector.shape_cast %22 : vector<2x4x8x8xf32> to vector<8x8x8xf32>
    "tpu.trace_start"() <{level = 10 : i32, message = "bnk,bmk->bnm"}> : () -> ()
    %cst_17 = arith.constant dense<0.000000e+00> : vector<8x8x8xf32>
    %24 = tpu.matmul %11, %17, %cst_17 {dimension_numbers = #tpu.dot_dimension_numbers<[2], [2], [1], [1], [0, 0, 0, 1, 1, 1], [0], [0]>} : vector<8x8x8xf32>, vector<8x8x8xf32>, vector<8x8x8xf32> -> vector<8x8x8xf32>
    "tpu.trace_stop"() : () -> ()
    %cst_18 = arith.constant dense<0xFF800000> : vector<8x8xf32>
    %25 = vector.multi_reduction <maximumf>, %24, %cst_18 [2] : vector<8x8x8xf32> to vector<8x8xf32>
    %26 = vector.shape_cast %25 : vector<8x8xf32> to vector<8x8x1xf32>
    %27 = vector.broadcast %26 : vector<8x8x1xf32> to vector<8x8x8xf32>
    %28 = arith.subf %24, %27 : vector<8x8x8xf32>
    %29 = math.exp %28 : vector<8x8x8xf32>
    %cst_19 = arith.constant dense<0.000000e+00> : vector<8x8xf32>
    %30 = vector.multi_reduction <add>, %29, %cst_19 [2] : vector<8x8x8xf32> to vector<8x8xf32>
    %31 = vector.shape_cast %30 : vector<8x8xf32> to vector<8x8x1xf32>
    %32 = vector.broadcast %31 : vector<8x8x1xf32> to vector<8x8x8xf32>
    %33 = arith.divf %29, %32 : vector<8x8x8xf32>
    "tpu.trace_start"() <{level = 10 : i32, message = "bnm,bmk->bnk"}> : () -> ()
    %cst_20 = arith.constant dense<0.000000e+00> : vector<8x8x8xf32>
    %34 = tpu.matmul %33, %23, %cst_20 {dimension_numbers = #tpu.dot_dimension_numbers<[2], [1], [1], [2], [0, 0, 0, 1, 1, 2], [0], [0]>} : vector<8x8x8xf32>, vector<8x8x8xf32>, vector<8x8x8xf32> -> vector<8x8x8xf32>
    "tpu.trace_stop"() : () -> ()
    %35 = vector.shape_cast %34 : vector<8x8x8xf32> to vector<2x4x8x8xf32>
    %36 = tpu.transpose %35, [0, 2, 1, 3] : vector<2x4x8x8xf32> -> vector<2x8x4x8xf32>
    %37 = vector.shape_cast %36 : vector<2x8x4x8xf32> to vector<16x32xf32>
    %c0_21 = arith.constant 0 : index
    %c0_22 = arith.constant 0 : index
    %c0_23 = arith.constant 0 : index
    %38 = vector.load %arg6[%c0_21, %c0_22, %c0_23] : memref<2x32x32xf32, #tpu.memory_space<vmem>>, vector<1x32x32xf32>
    %39 = vector.shape_cast %38 : vector<1x32x32xf32> to vector<32x32xf32>
    %cst_24 = arith.constant dense<0.000000e+00> : vector<16x32xf32>
    %40 = tpu.matmul %37, %39, %cst_24 {dimension_numbers = #tpu.dot_dimension_numbers<[1], [0], [0], [1], [0, 0, 1, 1], [], []>} : vector<16x32xf32>, vector<32x32xf32>, vector<16x32xf32> -> vector<16x32xf32>
    %41 = arith.addf %5, %40 : vector<16x32xf32>
    %c0_25 = arith.constant 0 : index
    %c0_26 = arith.constant 0 : index
    %c0_27 = arith.constant 0 : index
    %42 = vector.load %arg7[%c0_25, %c0_26, %c0_27] : memref<2x1x32xf32, #tpu.memory_space<vmem>>, vector<1x1x32xf32>
    %43 = vector.shape_cast %42 : vector<1x1x32xf32> to vector<1x32xf32>
    %c0_28 = arith.constant 0 : index
    %c0_29 = arith.constant 0 : index
    %c0_30 = arith.constant 0 : index
    %44 = vector.load %arg8[%c0_28, %c0_29, %c0_30] : memref<2x1x32xf32, #tpu.memory_space<vmem>>, vector<1x1x32xf32>
    %45 = vector.shape_cast %44 : vector<1x1x32xf32> to vector<1x32xf32>
    %cst_31 = arith.constant dense<0.000000e+00> : vector<32xf32>
    %46 = vector.multi_reduction <add>, %41, %cst_31 [0] : vector<16x32xf32> to vector<32xf32>
    %47 = vector.shape_cast %46 : vector<32xf32> to vector<1x32xf32>
    %cst_32 = arith.constant 1.600000e+01 : f32
    %48 = vector.broadcast %cst_32 : f32 to vector<1x32xf32>
    %49 = arith.divf %47, %48 : vector<1x32xf32>
    %50 = vector.broadcast %49 : vector<1x32xf32> to vector<16x32xf32>
    %51 = arith.subf %41, %50 : vector<16x32xf32>
    %52 = arith.mulf %51, %51 : vector<16x32xf32>
    %cst_33 = arith.constant dense<0.000000e+00> : vector<32xf32>
    %53 = vector.multi_reduction <add>, %52, %cst_33 [0] : vector<16x32xf32> to vector<32xf32>
    %54 = vector.shape_cast %53 : vector<32xf32> to vector<1x32xf32>
    %cst_34 = arith.constant 1.600000e+01 : f32
    %55 = vector.broadcast %cst_34 : f32 to vector<1x32xf32>
    %56 = arith.divf %54, %55 : vector<1x32xf32>
    %cst_35 = arith.constant 9.99999974E-6 : f32
    %57 = vector.broadcast %cst_35 : f32 to vector<1x32xf32>
    %58 = arith.addf %56, %57 : vector<1x32xf32>
    %59 = math.rsqrt %58 : vector<1x32xf32>
    %60 = vector.broadcast %59 : vector<1x32xf32> to vector<16x32xf32>
    %61 = arith.mulf %51, %60 : vector<16x32xf32>
    %62 = vector.broadcast %43 : vector<1x32xf32> to vector<16x32xf32>
    %63 = arith.mulf %61, %62 : vector<16x32xf32>
    %64 = vector.broadcast %45 : vector<1x32xf32> to vector<16x32xf32>
    %65 = arith.addf %63, %64 : vector<16x32xf32>
    %c0_36 = arith.constant 0 : index
    %c0_37 = arith.constant 0 : index
    %c0_38 = arith.constant 0 : index
    %66 = vector.load %arg9[%c0_36, %c0_37, %c0_38] : memref<2x32x64xf32, #tpu.memory_space<vmem>>, vector<1x32x64xf32>
    %67 = vector.shape_cast %66 : vector<1x32x64xf32> to vector<32x64xf32>
    %cst_39 = arith.constant dense<0.000000e+00> : vector<16x64xf32>
    %68 = tpu.matmul %65, %67, %cst_39 {dimension_numbers = #tpu.dot_dimension_numbers<[1], [0], [0], [1], [0, 0, 1, 1], [], []>} : vector<16x32xf32>, vector<32x64xf32>, vector<16x64xf32> -> vector<16x64xf32>
    %c0_40 = arith.constant 0 : index
    %c0_41 = arith.constant 0 : index
    %c0_42 = arith.constant 0 : index
    %69 = vector.load %arg10[%c0_40, %c0_41, %c0_42] : memref<2x1x64xf32, #tpu.memory_space<vmem>>, vector<1x1x64xf32>
    %70 = vector.shape_cast %69 : vector<1x1x64xf32> to vector<1x64xf32>
    %71 = vector.broadcast %70 : vector<1x64xf32> to vector<16x64xf32>
    %72 = arith.addf %68, %71 : vector<16x64xf32>
    %cst_43 = arith.constant 0.000000e+00 : f32
    %73 = vector.broadcast %cst_43 : f32 to vector<16x64xf32>
    %74 = arith.maximumf %72, %73 : vector<16x64xf32>
    %c0_44 = arith.constant 0 : index
    %c0_45 = arith.constant 0 : index
    %c0_46 = arith.constant 0 : index
    %75 = vector.load %arg11[%c0_44, %c0_45, %c0_46] : memref<2x64x32xf32, #tpu.memory_space<vmem>>, vector<1x64x32xf32>
    %76 = vector.shape_cast %75 : vector<1x64x32xf32> to vector<64x32xf32>
    %cst_47 = arith.constant dense<0.000000e+00> : vector<16x32xf32>
    %77 = tpu.matmul %74, %76, %cst_47 {dimension_numbers = #tpu.dot_dimension_numbers<[1], [0], [0], [1], [0, 0, 1, 1], [], []>} : vector<16x64xf32>, vector<64x32xf32>, vector<16x32xf32> -> vector<16x32xf32>
    %c0_48 = arith.constant 0 : index
    %c0_49 = arith.constant 0 : index
    %c0_50 = arith.constant 0 : index
    %78 = vector.load %arg12[%c0_48, %c0_49, %c0_50] : memref<2x1x32xf32, #tpu.memory_space<vmem>>, vector<1x1x32xf32>
    %79 = vector.shape_cast %78 : vector<1x1x32xf32> to vector<1x32xf32>
    %80 = vector.broadcast %79 : vector<1x32xf32> to vector<16x32xf32>
    %81 = arith.addf %77, %80 : vector<16x32xf32>
    %82 = arith.addf %65, %81 : vector<16x32xf32>
    %c0_51 = arith.constant 0 : index
    %c0_52 = arith.constant 0 : index
    %c0_53 = arith.constant 0 : index
    %83 = vector.load %arg13[%c0_51, %c0_52, %c0_53] : memref<2x1x32xf32, #tpu.memory_space<vmem>>, vector<1x1x32xf32>
    %84 = vector.shape_cast %83 : vector<1x1x32xf32> to vector<1x32xf32>
    %c0_54 = arith.constant 0 : index
    %c0_55 = arith.constant 0 : index
    %c0_56 = arith.constant 0 : index
    %85 = vector.load %arg14[%c0_54, %c0_55, %c0_56] : memref<2x1x32xf32, #tpu.memory_space<vmem>>, vector<1x1x32xf32>
    %86 = vector.shape_cast %85 : vector<1x1x32xf32> to vector<1x32xf32>
    %cst_57 = arith.constant dense<0.000000e+00> : vector<32xf32>
    %87 = vector.multi_reduction <add>, %82, %cst_57 [0] : vector<16x32xf32> to vector<32xf32>
    %88 = vector.shape_cast %87 : vector<32xf32> to vector<1x32xf32>
    %cst_58 = arith.constant 1.600000e+01 : f32
    %89 = vector.broadcast %cst_58 : f32 to vector<1x32xf32>
    %90 = arith.divf %88, %89 : vector<1x32xf32>
    %91 = vector.broadcast %90 : vector<1x32xf32> to vector<16x32xf32>
    %92 = arith.subf %82, %91 : vector<16x32xf32>
    %93 = arith.mulf %92, %92 : vector<16x32xf32>
    %cst_59 = arith.constant dense<0.000000e+00> : vector<32xf32>
    %94 = vector.multi_reduction <add>, %93, %cst_59 [0] : vector<16x32xf32> to vector<32xf32>
    %95 = vector.shape_cast %94 : vector<32xf32> to vector<1x32xf32>
    %cst_60 = arith.constant 1.600000e+01 : f32
    %96 = vector.broadcast %cst_60 : f32 to vector<1x32xf32>
    %97 = arith.divf %95, %96 : vector<1x32xf32>
    %cst_61 = arith.constant 9.99999974E-6 : f32
    %98 = vector.broadcast %cst_61 : f32 to vector<1x32xf32>
    %99 = arith.addf %97, %98 : vector<1x32xf32>
    %100 = math.rsqrt %99 : vector<1x32xf32>
    %101 = vector.broadcast %100 : vector<1x32xf32> to vector<16x32xf32>
    %102 = arith.mulf %92, %101 : vector<16x32xf32>
    %103 = vector.broadcast %84 : vector<1x32xf32> to vector<16x32xf32>
    %104 = arith.mulf %102, %103 : vector<16x32xf32>
    %105 = vector.broadcast %86 : vector<1x32xf32> to vector<16x32xf32>
    %106 = arith.addf %104, %105 : vector<16x32xf32>
    %c1 = arith.constant 1 : index
    %c0_62 = arith.constant 0 : index
    %c0_63 = arith.constant 0 : index
    %107 = vector.load %arg3[%c1, %c0_62, %c0_63] : memref<2x32x32xf32, #tpu.memory_space<vmem>>, vector<1x32x32xf32>
    %108 = vector.shape_cast %107 : vector<1x32x32xf32> to vector<32x32xf32>
    %cst_64 = arith.constant dense<0.000000e+00> : vector<16x32xf32>
    %109 = tpu.matmul %106, %108, %cst_64 {dimension_numbers = #tpu.dot_dimension_numbers<[1], [0], [0], [1], [0, 0, 1, 1], [], []>} : vector<16x32xf32>, vector<32x32xf32>, vector<16x32xf32> -> vector<16x32xf32>
    %110 = vector.shape_cast %109 : vector<16x32xf32> to vector<2x8x4x8xf32>
    %111 = tpu.transpose %110, [0, 2, 1, 3] : vector<2x8x4x8xf32> -> vector<2x4x8x8xf32>
    %112 = vector.shape_cast %111 : vector<2x4x8x8xf32> to vector<8x8x8xf32>
    %c1_65 = arith.constant 1 : index
    %c0_66 = arith.constant 0 : index
    %c0_67 = arith.constant 0 : index
    %113 = vector.load %arg4[%c1_65, %c0_66, %c0_67] : memref<2x32x32xf32, #tpu.memory_space<vmem>>, vector<1x32x32xf32>
    %114 = vector.shape_cast %113 : vector<1x32x32xf32> to vector<32x32xf32>
    %cst_68 = arith.constant dense<0.000000e+00> : vector<16x32xf32>
    %115 = tpu.matmul %106, %114, %cst_68 {dimension_numbers = #tpu.dot_dimension_numbers<[1], [0], [0], [1], [0, 0, 1, 1], [], []>} : vector<16x32xf32>, vector<32x32xf32>, vector<16x32xf32> -> vector<16x32xf32>
    %116 = vector.shape_cast %115 : vector<16x32xf32> to vector<2x8x4x8xf32>
    %117 = tpu.transpose %116, [0, 2, 1, 3] : vector<2x8x4x8xf32> -> vector<2x4x8x8xf32>
    %118 = vector.shape_cast %117 : vector<2x4x8x8xf32> to vector<8x8x8xf32>
    %c1_69 = arith.constant 1 : index
    %c0_70 = arith.constant 0 : index
    %c0_71 = arith.constant 0 : index
    %119 = vector.load %arg5[%c1_69, %c0_70, %c0_71] : memref<2x32x32xf32, #tpu.memory_space<vmem>>, vector<1x32x32xf32>
    %120 = vector.shape_cast %119 : vector<1x32x32xf32> to vector<32x32xf32>
    %cst_72 = arith.constant dense<0.000000e+00> : vector<16x32xf32>
    %121 = tpu.matmul %106, %120, %cst_72 {dimension_numbers = #tpu.dot_dimension_numbers<[1], [0], [0], [1], [0, 0, 1, 1], [], []>} : vector<16x32xf32>, vector<32x32xf32>, vector<16x32xf32> -> vector<16x32xf32>
    %122 = vector.shape_cast %121 : vector<16x32xf32> to vector<2x8x4x8xf32>
    %123 = tpu.transpose %122, [0, 2, 1, 3] : vector<2x8x4x8xf32> -> vector<2x4x8x8xf32>
    %124 = vector.shape_cast %123 : vector<2x4x8x8xf32> to vector<8x8x8xf32>
    "tpu.trace_start"() <{level = 10 : i32, message = "bnk,bmk->bnm"}> : () -> ()
    %cst_73 = arith.constant dense<0.000000e+00> : vector<8x8x8xf32>
    %125 = tpu.matmul %112, %118, %cst_73 {dimension_numbers = #tpu.dot_dimension_numbers<[2], [2], [1], [1], [0, 0, 0, 1, 1, 1], [0], [0]>} : vector<8x8x8xf32>, vector<8x8x8xf32>, vector<8x8x8xf32> -> vector<8x8x8xf32>
    "tpu.trace_stop"() : () -> ()
    %cst_74 = arith.constant dense<0xFF800000> : vector<8x8xf32>
    %126 = vector.multi_reduction <maximumf>, %125, %cst_74 [2] : vector<8x8x8xf32> to vector<8x8xf32>
    %127 = vector.shape_cast %126 : vector<8x8xf32> to vector<8x8x1xf32>
    %128 = vector.broadcast %127 : vector<8x8x1xf32> to vector<8x8x8xf32>
    %129 = arith.subf %125, %128 : vector<8x8x8xf32>
    %130 = math.exp %129 : vector<8x8x8xf32>
    %cst_75 = arith.constant dense<0.000000e+00> : vector<8x8xf32>
    %131 = vector.multi_reduction <add>, %130, %cst_75 [2] : vector<8x8x8xf32> to vector<8x8xf32>
    %132 = vector.shape_cast %131 : vector<8x8xf32> to vector<8x8x1xf32>
    %133 = vector.broadcast %132 : vector<8x8x1xf32> to vector<8x8x8xf32>
    %134 = arith.divf %130, %133 : vector<8x8x8xf32>
    "tpu.trace_start"() <{level = 10 : i32, message = "bnm,bmk->bnk"}> : () -> ()
    %cst_76 = arith.constant dense<0.000000e+00> : vector<8x8x8xf32>
    %135 = tpu.matmul %134, %124, %cst_76 {dimension_numbers = #tpu.dot_dimension_numbers<[2], [1], [1], [2], [0, 0, 0, 1, 1, 2], [0], [0]>} : vector<8x8x8xf32>, vector<8x8x8xf32>, vector<8x8x8xf32> -> vector<8x8x8xf32>
    "tpu.trace_stop"() : () -> ()
    %136 = vector.shape_cast %135 : vector<8x8x8xf32> to vector<2x4x8x8xf32>
    %137 = tpu.transpose %136, [0, 2, 1, 3] : vector<2x4x8x8xf32> -> vector<2x8x4x8xf32>
    %138 = vector.shape_cast %137 : vector<2x8x4x8xf32> to vector<16x32xf32>
    %c1_77 = arith.constant 1 : index
    %c0_78 = arith.constant 0 : index
    %c0_79 = arith.constant 0 : index
    %139 = vector.load %arg6[%c1_77, %c0_78, %c0_79] : memref<2x32x32xf32, #tpu.memory_space<vmem>>, vector<1x32x32xf32>
    %140 = vector.shape_cast %139 : vector<1x32x32xf32> to vector<32x32xf32>
    %cst_80 = arith.constant dense<0.000000e+00> : vector<16x32xf32>
    %141 = tpu.matmul %138, %140, %cst_80 {dimension_numbers = #tpu.dot_dimension_numbers<[1], [0], [0], [1], [0, 0, 1, 1], [], []>} : vector<16x32xf32>, vector<32x32xf32>, vector<16x32xf32> -> vector<16x32xf32>
    %142 = arith.addf %106, %141 : vector<16x32xf32>
    %c1_81 = arith.constant 1 : index
    %c0_82 = arith.constant 0 : index
    %c0_83 = arith.constant 0 : index
    %143 = vector.load %arg7[%c1_81, %c0_82, %c0_83] : memref<2x1x32xf32, #tpu.memory_space<vmem>>, vector<1x1x32xf32>
    %144 = vector.shape_cast %143 : vector<1x1x32xf32> to vector<1x32xf32>
    %c1_84 = arith.constant 1 : index
    %c0_85 = arith.constant 0 : index
    %c0_86 = arith.constant 0 : index
    %145 = vector.load %arg8[%c1_84, %c0_85, %c0_86] : memref<2x1x32xf32, #tpu.memory_space<vmem>>, vector<1x1x32xf32>
    %146 = vector.shape_cast %145 : vector<1x1x32xf32> to vector<1x32xf32>
    %cst_87 = arith.constant dense<0.000000e+00> : vector<32xf32>
    %147 = vector.multi_reduction <add>, %142, %cst_87 [0] : vector<16x32xf32> to vector<32xf32>
    %148 = vector.shape_cast %147 : vector<32xf32> to vector<1x32xf32>
    %cst_88 = arith.constant 1.600000e+01 : f32
    %149 = vector.broadcast %cst_88 : f32 to vector<1x32xf32>
    %150 = arith.divf %148, %149 : vector<1x32xf32>
    %151 = vector.broadcast %150 : vector<1x32xf32> to vector<16x32xf32>
    %152 = arith.subf %142, %151 : vector<16x32xf32>
    %153 = arith.mulf %152, %152 : vector<16x32xf32>
    %cst_89 = arith.constant dense<0.000000e+00> : vector<32xf32>
    %154 = vector.multi_reduction <add>, %153, %cst_89 [0] : vector<16x32xf32> to vector<32xf32>
    %155 = vector.shape_cast %154 : vector<32xf32> to vector<1x32xf32>
    %cst_90 = arith.constant 1.600000e+01 : f32
    %156 = vector.broadcast %cst_90 : f32 to vector<1x32xf32>
    %157 = arith.divf %155, %156 : vector<1x32xf32>
    %cst_91 = arith.constant 9.99999974E-6 : f32
    %158 = vector.broadcast %cst_91 : f32 to vector<1x32xf32>
    %159 = arith.addf %157, %158 : vector<1x32xf32>
    %160 = math.rsqrt %159 : vector<1x32xf32>
    %161 = vector.broadcast %160 : vector<1x32xf32> to vector<16x32xf32>
    %162 = arith.mulf %152, %161 : vector<16x32xf32>
    %163 = vector.broadcast %144 : vector<1x32xf32> to vector<16x32xf32>
    %164 = arith.mulf %162, %163 : vector<16x32xf32>
    %165 = vector.broadcast %146 : vector<1x32xf32> to vector<16x32xf32>
    %166 = arith.addf %164, %165 : vector<16x32xf32>
    %c1_92 = arith.constant 1 : index
    %c0_93 = arith.constant 0 : index
    %c0_94 = arith.constant 0 : index
    %167 = vector.load %arg9[%c1_92, %c0_93, %c0_94] : memref<2x32x64xf32, #tpu.memory_space<vmem>>, vector<1x32x64xf32>
    %168 = vector.shape_cast %167 : vector<1x32x64xf32> to vector<32x64xf32>
    %cst_95 = arith.constant dense<0.000000e+00> : vector<16x64xf32>
    %169 = tpu.matmul %166, %168, %cst_95 {dimension_numbers = #tpu.dot_dimension_numbers<[1], [0], [0], [1], [0, 0, 1, 1], [], []>} : vector<16x32xf32>, vector<32x64xf32>, vector<16x64xf32> -> vector<16x64xf32>
    %c1_96 = arith.constant 1 : index
    %c0_97 = arith.constant 0 : index
    %c0_98 = arith.constant 0 : index
    %170 = vector.load %arg10[%c1_96, %c0_97, %c0_98] : memref<2x1x64xf32, #tpu.memory_space<vmem>>, vector<1x1x64xf32>
    %171 = vector.shape_cast %170 : vector<1x1x64xf32> to vector<1x64xf32>
    %172 = vector.broadcast %171 : vector<1x64xf32> to vector<16x64xf32>
    %173 = arith.addf %169, %172 : vector<16x64xf32>
    %cst_99 = arith.constant 0.000000e+00 : f32
    %174 = vector.broadcast %cst_99 : f32 to vector<16x64xf32>
    %175 = arith.maximumf %173, %174 : vector<16x64xf32>
    %c1_100 = arith.constant 1 : index
    %c0_101 = arith.constant 0 : index
    %c0_102 = arith.constant 0 : index
    %176 = vector.load %arg11[%c1_100, %c0_101, %c0_102] : memref<2x64x32xf32, #tpu.memory_space<vmem>>, vector<1x64x32xf32>
    %177 = vector.shape_cast %176 : vector<1x64x32xf32> to vector<64x32xf32>
    %cst_103 = arith.constant dense<0.000000e+00> : vector<16x32xf32>
    %178 = tpu.matmul %175, %177, %cst_103 {dimension_numbers = #tpu.dot_dimension_numbers<[1], [0], [0], [1], [0, 0, 1, 1], [], []>} : vector<16x64xf32>, vector<64x32xf32>, vector<16x32xf32> -> vector<16x32xf32>
    %c1_104 = arith.constant 1 : index
    %c0_105 = arith.constant 0 : index
    %c0_106 = arith.constant 0 : index
    %179 = vector.load %arg12[%c1_104, %c0_105, %c0_106] : memref<2x1x32xf32, #tpu.memory_space<vmem>>, vector<1x1x32xf32>
    %180 = vector.shape_cast %179 : vector<1x1x32xf32> to vector<1x32xf32>
    %181 = vector.broadcast %180 : vector<1x32xf32> to vector<16x32xf32>
    %182 = arith.addf %178, %181 : vector<16x32xf32>
    %183 = arith.addf %166, %182 : vector<16x32xf32>
    %c1_107 = arith.constant 1 : index
    %c0_108 = arith.constant 0 : index
    %c0_109 = arith.constant 0 : index
    %184 = vector.load %arg13[%c1_107, %c0_108, %c0_109] : memref<2x1x32xf32, #tpu.memory_space<vmem>>, vector<1x1x32xf32>
    %185 = vector.shape_cast %184 : vector<1x1x32xf32> to vector<1x32xf32>
    %c1_110 = arith.constant 1 : index
    %c0_111 = arith.constant 0 : index
    %c0_112 = arith.constant 0 : index
    %186 = vector.load %arg14[%c1_110, %c0_111, %c0_112] : memref<2x1x32xf32, #tpu.memory_space<vmem>>, vector<1x1x32xf32>
    %187 = vector.shape_cast %186 : vector<1x1x32xf32> to vector<1x32xf32>
    %cst_113 = arith.constant dense<0.000000e+00> : vector<32xf32>
    %188 = vector.multi_reduction <add>, %183, %cst_113 [0] : vector<16x32xf32> to vector<32xf32>
    %189 = vector.shape_cast %188 : vector<32xf32> to vector<1x32xf32>
    %cst_114 = arith.constant 1.600000e+01 : f32
    %190 = vector.broadcast %cst_114 : f32 to vector<1x32xf32>
    %191 = arith.divf %189, %190 : vector<1x32xf32>
    %192 = vector.broadcast %191 : vector<1x32xf32> to vector<16x32xf32>
    %193 = arith.subf %183, %192 : vector<16x32xf32>
    %194 = arith.mulf %193, %193 : vector<16x32xf32>
    %cst_115 = arith.constant dense<0.000000e+00> : vector<32xf32>
    %195 = vector.multi_reduction <add>, %194, %cst_115 [0] : vector<16x32xf32> to vector<32xf32>
    %196 = vector.shape_cast %195 : vector<32xf32> to vector<1x32xf32>
    %cst_116 = arith.constant 1.600000e+01 : f32
    %197 = vector.broadcast %cst_116 : f32 to vector<1x32xf32>
    %198 = arith.divf %196, %197 : vector<1x32xf32>
    %cst_117 = arith.constant 9.99999974E-6 : f32
    %199 = vector.broadcast %cst_117 : f32 to vector<1x32xf32>
    %200 = arith.addf %198, %199 : vector<1x32xf32>
    %201 = math.rsqrt %200 : vector<1x32xf32>
    %202 = vector.broadcast %201 : vector<1x32xf32> to vector<16x32xf32>
    %203 = arith.mulf %193, %202 : vector<16x32xf32>
    %204 = vector.broadcast %185 : vector<1x32xf32> to vector<16x32xf32>
    %205 = arith.mulf %203, %204 : vector<16x32xf32>
    %206 = vector.broadcast %187 : vector<1x32xf32> to vector<16x32xf32>
    %207 = arith.addf %205, %206 : vector<16x32xf32>
    %c0_118 = arith.constant 0 : index
    %c0_119 = arith.constant 0 : index
    %208 = vector.load %arg15[%c0_118, %c0_119] : memref<16x32xf32, #tpu.memory_space<vmem>>, vector<16x32xf32>
    tpu.vector_store %arg15[%c0_118, %c0_119], %207 {strides = array<i32>} : memref<16x32xf32, #tpu.memory_space<vmem>>, vector<16x32xf32>,
    return
  }
}

</mosaic_0001>

<bundles_post_ra>
// kernel: tpu_custom_call.1
= control target key start
LH: loop header
LB: loop body
LE: loop exit
PB: predicated region body
PF: predicated region fallthrough
CT: control target
= control target key end

     0   :  { %20 = vsyncpa [#allocation3], 0  ;;  %s8154_s0 = inlined_call_operand.vmem [shape: f32[16,4], index: 0, kind: input, shape index: {}]   ;;  %s8155_s1 = inlined_call_operand.vmem [shape: f32[4,32], index: 1, kind: input, shape index: {}]   ;;  %s8156_s2 = inlined_call_operand.vmem [shape: f32[1,32], index: 2, kind: input, shape index: {}]   ;;  %s8157_s3 = inlined_call_operand.vmem [shape: f32[2,32,32], index: 3, kind: input, shape index: {}]   ;;  %s8158_s4 = inlined_call_operand.vmem [shape: f32[2,32,32], index: 4, kind: input, shape index: {}]   ;;  %s8159_s5 = inlined_call_operand.vmem [shape: f32[2,32,32], index: 5, kind: input, shape index: {}]   ;;  %s8160_s6 = inlined_call_operand.hbm [shape: f32[2,32,32], index: 6, kind: input, shape index: {}]   ;;  %s8161_s7 = inlined_call_operand.vmem [shape: f32[2,1,32], index: 7, kind: input, shape index: {}]   ;;  %s8162_s8 = inlined_call_operand.vmem [shape: f32[2,1,32], index: 8, kind: input, shape index: {}]   ;;  %s8163_s9 = inlined_call_operand.hbm [shape: f32[2,32,64], index: 9, kind: input, shape index: {}]   ;;  %s8164_s10 = inlined_call_operand.vmem [shape: f32[2,1,64], index: 10, kind: input, shape index: {}]   ;;  %s8165_s11 = inlined_call_operand.vmem [shape: f32[2,64,32], index: 11, kind: input, shape index: {}]   ;;  %s8166_s12 = inlined_call_operand.vmem [shape: f32[2,1,32], index: 12, kind: input, shape index: {}]   ;;  %s8167_s13 = inlined_call_operand.vmem [shape: f32[2,1,32], index: 13, kind: input, shape index: {}]   ;;  %s8168_s14 = inlined_call_operand.vmem [shape: f32[2,1,32], index: 14, kind: input, shape index: {}]   ;;  %s8169_s15 = inlined_call_operand.hbm [shape: f32[16,32], index: 15, kind: output, shape index: {}]  }
   0x1   :  { %21 = vsyncpa [#allocation6], 0 }
   0x2   :  { %22 = vsyncpa [#allocation4], 0  ;;  %s7115_s18 = smov [#allocation2]  }
   0x3   :  { %s40_s19 = sshll.u32 %s7115_s18, 4  ;;  %s41_s19 = int_to_ptr.vmem [resolvable:$true] %s40_s19 }
   0x4   :  { %s7057_s20 = scalar_lea.vmem %s41_s19, 1024  ;;  %p7062_p1 = scmp.lt.s32.totalorder %s41_s19, %s41_s19 }
   0x5   :  { %p7058_p0 = scmp.ne.s32.totalorder %s41_s19, %s7057_s20  ;;  %p7063_p2 = scmp.lt.s32.totalorder %s7057_s20, %s7057_s20 }
   0x7   :  { %p7064_p3 = por %p7063_p2, %p7062_p1 }
   0x9   :  { %p7065_p4 = pnand %p7064_p3, %p7058_p0 }
   0xb   :  { %7068 = shalt.err (!%p7065_p4)
}
   0xc   :  { %s7116_s21 = smov 128   ;;  %s7117_s22 = smov 8  }
   0xd   :  { %46 = dma.hbm_to_vmem [thread:$0]  %s8160_s6, 1024, %s41_s19, [#allocation3], %s7116_s21, %s7116_s21, %s7117_s22  }
   0xe   :  { %s7118_s25 = smov [#allocation5]  }
   0xf   :  { %s56_s26 = sshll.u32 %s7118_s25, 4  ;;  %s57_s26 = int_to_ptr.vmem [resolvable:$true] %s56_s26 }
  0x10   :  { %s7077_s27 = scalar_lea.vmem %s57_s26, 1024  ;;  %p7082_p6 = scmp.lt.s32.totalorder %s57_s26, %s57_s26 }
  0x11   :  { %p7078_p5 = scmp.ne.s32.totalorder %s57_s26, %s7077_s27  ;;  %p7083_p7 = scmp.lt.s32.totalorder %s7077_s27, %s7077_s27 }
  0x13   :  { %p7084_p8 = por %p7083_p7, %p7082_p6 }
  0x15   :  { %p7085_p9 = pnand %p7084_p8, %p7078_p5 }
  0x17   :  { %7088 = shalt.err (!%p7085_p9)
}
  0x18   :  { %62 = dma.hbm_to_vmem [thread:$0]  %s8163_s9, 1024, %s57_s26, [#allocation6], %s7116_s21, %s7116_s21, %s7117_s22  }
  0x19   :  { %7109 = dma.done.wait [#allocation3], 1024  }
  0x1a   :  { %7110 = vsyncadd [#allocation3], 4294966272 }
  0x1b   :  { %7111 = dma.done.wait [#allocation6], 1024  }
  0x1c   :  { %7112 = vsyncadd [#allocation6], 4294966272  ;;  %vm96_vm0 = vcmask 1043456   ;;  %vm89_vm1 = vcmask 31744   ;;  %v81_v0 = vld [vmem:[%s8155_s1] sm:$0xf]  ;;  %v286_v29 = vlaneseq }
  0x1d   :  { %v79_v1 = vld [vmem:[%s8154_s0] sm:$0xff]  ;;  %v80_v2 = vld [vmem:[%s8154_s0 + $0x8] sm:$0xff]  ;;  %6650 = vmatprep.subr.msk.mxu0 %vm96_vm0, %v81_v0  ;;  %v178_v3 = vld [vmem:[%s8157_s3 + $0x18] sm:$0xff]  ;;  %vm179_vm2 = vcmask 261120   ;;  %s7119_s27 = smov 120   ;;  %s7120_s28 = smov 104  }
  0x1e   :  { %6652 = vmatprep.mubr.msk.f32.mxu0 %vm89_vm1, %v79_v1  ;;  %v927_v4 = vld [vmem:[%s8159_s5 + $0x18] sm:$0xff]  ;;  %6651 = vmatpush3.msk.msra.mxu0 %vm96_vm0, %v81_v0  ;;  %v177_v5 = vld [vmem:[%s8157_s3 + $0x10] sm:$0xff]  ;;  %v176_v7 = vld [vmem:[%s8157_s3 + $0x8] sm:$0xff]  ;;  %s7121_s29 = smov 112   ;;  %v7122_v24 = vmov 0.0   ;;  %vm7123_vm3 = vmmov 0  }
  0x1f   :  { %6677 = vmatprep.subr.mxu1 %v927_v4  ;;  %6653 = vmatmul.mubr.msk.f32.vlgmr.msra.gmra.mxu0 %vm89_vm1, %v80_v2  ;;  %v926_v6 = vld [vmem:[%s8159_s5 + $0x10] sm:$0xff]  ;;  %v925_v8 = vld [vmem:[%s8159_s5 + $0x8] sm:$0xff]  ;;  %v175_v9 = vld [vmem:[%s8157_s3] sm:$0xff]  ;;  %v7124_v27 = vmov 1983009808   ;;  %v287_v34 = vshrl.u32 %v286_v29, 7 }
  0x20   :  { %6655 = vmatprep.subr.mxu0 %v178_v3  ;;  %6678 = vmatpush3.msra.mxu1 %v927_v4  ;;  %v924_v10 = vld [vmem:[%s8159_s5] sm:$0xff]  ;;  %v556_v11 = vld [vmem:[%s8158_s4 + $0x18] sm:$0xff]  ;;  %v555_v17 = vld [vmem:[%s8158_s4 + $0x10] sm:$0xff]  ;;  %v284_v28 = vunpack.c.l.s4 %v7124_v27  ;;  %v7125_v31 = vmov 1934713408   ;;  %vm1295_vm4 = vcmask 64512  }
  0x21   :  { %6656 = vmatpush3.msra.mxu0 %v178_v3  ;;  %6679 = vmatprep.subr.mxu1 %v926_v6  ;;  %v6357_v13 = vld [vmem:[%s8156_s2] ss:$0 sm:$0xff]  ;;  %v554_v18 = vld [vmem:[%s8158_s4 + $0x8] sm:$0xff]  ;;  %v316_v32 = vunpack.c.l.s4 %v7125_v31  ;;  %s7126_s6 = smov 16   ;;  %s7127_s30 = smov 24   ;;  %vm2874_vm5 = vcmask 130048  }
  0x22   :  { %6657 = vmatprep.subr.mxu0 %v177_v5  ;;  %6680 = vmatpush3.msra.mxu1 %v926_v6  ;;  %v553_v19 = vld [vmem:[%s8158_s4] sm:$0xff]  ;;  %v285_v33 = vunpack.c.0.s8 %v284_v28  ;;  %vm2877_vm6 = vcmask 195584   ;;  %vm3123_vm7 = vcmask 523264  }
  0x23   :  { %6658 = vmatpush3.msra.mxu0 %v177_v5  ;;  %6681 = vmatprep.subr.mxu1 %v925_v8  ;;  %v317_v37 = vunpack.c.0.s8 %v316_v32 }
  0x24   :  { %6659 = vmatprep.subr.mxu0 %v176_v7  ;;  %6682 = vmatpush3.msra.mxu1 %v925_v8  ;;  %v7324_v38 = vsub.s32 %v285_v33, %v287_v34 }
  0x25   :  { %6660 = vmatpush3.msra.mxu0 %v176_v7  ;;  %6683 = vmatprep.subr.mxu1 %v924_v10  ;;  %v7326_v47 = vsub.s32 %v317_v37, %v287_v34 }
  0x26   :  { %6661 = vmatprep.subr.mxu0 %v175_v9  ;;  %6684 = vmatpush3.msra.mxu1 %v924_v10 }
  0x27   :  { %6662 = vmatpush3.msra.mxu0 %v175_v9  ;;  %6698 = vmatprep.subr.mxu1 %v7122_v24 }
  0x28   :  { %6666 = vmatprep.subr.mxu0 %v556_v11 }
  0xdf   :  { %v6654_v12 = vpop.f32.mrf.mxu0 }
  0xe0   :  { %v7262_v16 = vadd.f32 %v6654_v12, %v6357_v13 }
  0xe1   :  { %v166_v14 = vpop.f32.mrf.mxu0 }
  0xe2   :  { %v7260_v15 = vadd.f32 %v6357_v13, %v166_v14 }
  0xe4   :  { %6663 = vmatprep.mubr.msk.f32.mxu0 %vm179_vm2, %v7260_v15  ;;  %6685 = vmatprep.mubr.msk.f32.mxu1 %vm179_vm2, %v7260_v15 }
  0xe5   :  { %6664 = vmatmul.mubr.msk.f32.vlgmr.msra.gmra.mxu0 %vm179_vm2, %v7262_v16  ;;  %6686 = vmatmul.mubr.msk.f32.vlgmr.msra.gmra.mxu1 %vm179_vm2, %v7262_v16 }
  0xe6   :  { %6667 = vmatpush3.msra.mxu0 %v556_v11  ;;  %6674 = vmatprep.mubr.msk.f32.mxu0 %vm179_vm2, %v7260_v15 }
  0xe7   :  { %6668 = vmatprep.subr.mxu0 %v555_v17  ;;  %6700 = vmatprep.mubr.msk.f32.mxu1 %vm7123_vm3, %v7122_v24 }
  0xe8   :  { %6669 = vmatpush3.msra.mxu0 %v555_v17 }
  0xe9   :  { %6670 = vmatprep.subr.mxu0 %v554_v18 }
  0xea   :  { %6671 = vmatpush3.msra.mxu0 %v554_v18 }
  0xeb   :  { %6672 = vmatprep.subr.mxu0 %v553_v19 }
  0xec   :  { %6673 = vmatpush3.msra.mxu0 %v553_v19 }
  0xed   :  { %6675 = vmatmul.mubr.msk.f32.vlgmr.msra.gmra.mxu0 %vm179_vm2, %v7262_v16  ;;  %6688 = vmatprep.subr.mxu0 %v7122_v24 }
  0xee   :  { %6690 = vmatprep.mubr.msk.f32.mxu0 %vm7123_vm3, %v7122_v24 }
 0x1a5   :  { %v7285_v20 = vpop.f32.mrf.mxu0  ;;  %v7308_v25 = vpop.f32.mrf.mxu1 }
 0x1a7   :  { %v7287_v21 = vpop.f32.mrf.mxu0  ;;  %v7314_v26 = vpop.f32.mrf.mxu1 }
 0x1a8   :  { %263 = vrot.lane.b32.xlu1 %v7287_v21, %s7119_s27 }
 0x1ad   :  { %v7291_v22 = vpop.f32.mrf.mxu0 }
 0x1af   :  { %v623_v23 = vpop.f32.mrf.mxu0 }
 0x1b0   :  { %646 = vrot.lane.b32.xlu1 %v623_v23, %s7120_s28  ;;  %634 = vrot.lane.b32.xlu0 %v623_v23, %s7119_s27 }
 0x1b4   :  { %275 = vrot.lane.b32.xlu1 %v7287_v21, %s7120_s28  ;;  %640 = vrot.lane.b32.xlu0 %v623_v23, %s7121_s29 }
 0x1b8   :  { %642 = vrot.lane.b32.xlu1 %v7291_v22, %s7121_s29  ;;  %269 = vrot.lane.b32.xlu0 %v7287_v21, %s7121_s29 }
 0x1bc   :  { %265 = vrot.lane.b32.xlu1 %v7285_v20, %s7119_s27  ;;  %636 = vrot.lane.b32.xlu0 %v7291_v22, %s7119_s27 }
 0x1c0   :  { %277 = vrot.lane.b32.xlu1 %v7285_v20, %s7120_s28  ;;  %648 = vrot.lane.b32.xlu0 %v7291_v22, %s7120_s28 }
 0x1c4   :  { %1005 = vrot.lane.b32.xlu1 %v7314_v26, %s7119_s27  ;;  %271 = vrot.lane.b32.xlu0 %v7285_v20, %s7121_s29 }
 0x21a   :  { %v264_v30 = vpop.permute.xlu1 %263 }
 0x222   :  { %v647_v35 = vpop.permute.xlu1 %646  ;;  %v635_v36 = vpop.permute.xlu0 %634 }
 0x223   :  { %v668_v39 = vcombine.low %v635_v36, %v647_v35  ;;  %v669_v40 = vcombine.high %v635_v36, %v647_v35 }
 0x225   :  { %v676_v48 = vrot.slane %v668_v39, %v7324_v38  ;;  %v683_v49 = vrot.slane %v669_v40, %v7324_v38 }
 0x226   :  { %v276_v41 = vpop.permute.xlu1 %275  ;;  %v641_v42 = vpop.permute.xlu0 %640 }
 0x227   :  { %v652_v43 = vcombine.low %v623_v23, %v641_v42  ;;  %v653_v44 = vcombine.high %v623_v23, %v641_v42  ;;  %v297_v45 = vcombine.low %v264_v30, %v276_v41  ;;  %v298_v46 = vcombine.high %v264_v30, %v276_v41 }
 0x229   :  { %v660_v50 = vrot.slane %v652_v43, %v7324_v38  ;;  %v667_v51 = vrot.slane %v653_v44, %v7324_v38  ;;  %v305_v58 = vrot.slane %v297_v45, %v7324_v38  ;;  %v312_v59 = vrot.slane %v298_v46, %v7324_v38 }
 0x22a   :  { %v643_v52 = vpop.permute.xlu1 %642  ;;  %v270_v53 = vpop.permute.xlu0 %269 }
 0x22b   :  { %v684_v54 = vcombine.low %v660_v50, %v676_v48  ;;  %v685_v55 = vcombine.high %v660_v50, %v676_v48  ;;  %v700_v56 = vcombine.low %v667_v51, %v683_v49  ;;  %v701_v57 = vcombine.high %v667_v51, %v683_v49 }
 0x22c   :  { %v281_v60 = vcombine.low %v7287_v21, %v270_v53  ;;  %v282_v61 = vcombine.high %v7287_v21, %v270_v53  ;;  %v720_v2 = vcombine.low %v7291_v22, %v643_v52  ;;  %v721_v3 = vcombine.high %v7291_v22, %v643_v52 }
 0x22d   :  { %v692_v62 = vrot.slane %v684_v54, %v7326_v47  ;;  %v699_v63 = vrot.slane %v685_v55, %v7326_v47  ;;  %v708_v0 = vrot.slane %v700_v56, %v7326_v47  ;;  %v715_v1 = vrot.slane %v701_v57, %v7326_v47 }
 0x22e   :  { %v289_v4 = vrot.slane %v281_v60, %v7324_v38  ;;  %v296_v5 = vrot.slane %v282_v61, %v7324_v38  ;;  %v266_v6 = vpop.permute.xlu1 %265  ;;  %v637_v7 = vpop.permute.xlu0 %636  ;;  %v728_v33 = vrot.slane %v720_v2, %v7324_v38  ;;  %v735_v34 = vrot.slane %v721_v3, %v7324_v38 }
 0x22f   :  { %v788_v8 = vcombine.low %v692_v62, %v699_v63  ;;  %v6369_v9 = vcombine.high %v692_v62, %v699_v63  ;;  %v804_v10 = vcombine.low %v708_v0, %v715_v1  ;;  %v6370_v11 = vcombine.high %v708_v0, %v715_v1 }
 0x230   :  { %v313_v12 = vcombine.low %v289_v4, %v305_v58  ;;  %v314_v13 = vcombine.high %v289_v4, %v305_v58  ;;  %v329_v14 = vcombine.low %v296_v5, %v312_v59  ;;  %v330_v17 = vcombine.high %v296_v5, %v312_v59 }
 0x231   :  { %v7345_v18 = vrot.slane %v788_v8, %v7324_v38  ;;  %v7348_v19 = vrot.slane %v6369_v9, %v7324_v38  ;;  %v7351_v21 = vrot.slane %v804_v10, %v7324_v38  ;;  %v7354_v22 = vrot.slane %v6370_v11, %v7324_v38 }
 0x232   :  { %v321_v23 = vrot.slane %v313_v12, %v7326_v47  ;;  %v328_v27 = vrot.slane %v314_v13, %v7326_v47  ;;  %v337_v28 = vrot.slane %v329_v14, %v7326_v47  ;;  %v344_v29 = vrot.slane %v330_v17, %v7326_v47  ;;  %v278_v30 = vpop.permute.xlu1 %277  ;;  %v649_v31 = vpop.permute.xlu0 %648 }
 0x233   :  { %v820_v32 = vcombine.low %v7345_v18, %v7348_v19  ;;  %v365_v40 = vcombine.low %v266_v6, %v278_v30  ;;  %v366_v41 = vcombine.high %v266_v6, %v278_v30  ;;  %v736_v42 = vcombine.low %v637_v7, %v649_v31 }
 0x234   :  { %v417_v35 = vcombine.low %v321_v23, %v328_v27  ;;  %v6363_v36 = vcombine.high %v321_v23, %v328_v27  ;;  %v433_v37 = vcombine.low %v337_v28, %v344_v29  ;;  %v6364_v39 = vcombine.high %v337_v28, %v344_v29 }
 0x235   :  { %v737_v43 = vcombine.high %v637_v7, %v649_v31  ;;  %v821_v44 = vcombine.high %v7345_v18, %v7348_v19  ;;  %v836_v45 = vcombine.low %v7351_v21, %v7354_v22  ;;  %v837_v49 = vcombine.high %v7351_v21, %v7354_v22 }
 0x236   :  { %v7369_v46 = vrot.slane %v417_v35, %v7324_v38  ;;  %v7372_v48 = vrot.slane %v6363_v36, %v7324_v38  ;;  %v440_v50 = vrot.slane %v433_v37, %v7324_v38  ;;  %v744_v51 = vrot.slane %v736_v42, %v7324_v38  ;;  %v272_v53 = vpop.permute.xlu0 %271 }
 0x237   :  { %v751_v52 = vrot.slane %v737_v43, %v7324_v38  ;;  %v448_v54 = vrot.slane %v6364_v39, %v7324_v38  ;;  %v373_v56 = vrot.slane %v365_v40, %v7324_v38  ;;  %v380_v57 = vrot.slane %v366_v41, %v7324_v38 }
 0x238   :  { %v449_v55 = vcombine.low %v7369_v46, %v7372_v48  ;;  %v752_v58 = vcombine.low %v728_v33, %v744_v51  ;;  %v753_v59 = vcombine.high %v728_v33, %v744_v51  ;;  %v349_v62 = vcombine.low %v7285_v20, %v272_v53 }
 0x239   :  { %v768_v60 = vcombine.low %v735_v34, %v751_v52  ;;  %v769_v61 = vcombine.high %v735_v34, %v751_v52  ;;  %v350_v63 = vcombine.high %v7285_v20, %v272_v53  ;;  %v828_v0 = vrot.slane %v820_v32, %v7326_v47 }
 0x23a   :  { %v844_v1 = vrot.slane %v836_v45, %v7326_v47  ;;  %v760_v2 = vrot.slane %v752_v58, %v7326_v47  ;;  %v767_v3 = vrot.slane %v753_v59, %v7326_v47  ;;  %v465_v6 = vcombine.low %v440_v50, %v448_v54 }
 0x23b   :  { %v776_v4 = vrot.slane %v768_v60, %v7326_v47  ;;  %v783_v5 = vrot.slane %v769_v61, %v7326_v47  ;;  %v357_v7 = vrot.slane %v349_v62, %v7324_v38  ;;  %v364_v8 = vrot.slane %v350_v63, %v7324_v38 }
 0x23c   :  { %v852_v9 = vcombine.low %v828_v0, %v844_v1  ;;  %v856_v10 = vcombine.low %v760_v2, %v767_v3  ;;  %v6371_v20 = vcombine.high %v760_v2, %v767_v3  ;;  %v450_v31 = vcombine.high %v7369_v46, %v7372_v48 }
 0x23d   :  { %v872_v11 = vcombine.low %v776_v4, %v783_v5  ;;  %v6372_v12 = vcombine.high %v776_v4, %v783_v5  ;;  %v381_v13 = vcombine.low %v357_v7, %v373_v56  ;;  %v382_v14 = vcombine.high %v357_v7, %v373_v56 }
 0x23e   :  { %v397_v17 = vcombine.low %v364_v8, %v380_v57  ;;  %v398_v18 = vcombine.high %v364_v8, %v380_v57  ;;  %6689 = vmatpush3.xpose.msk.msra.mxu0 %vm1295_vm4, %v852_v9  ;;  %v863_v19 = vrot.slane %v856_v10, %v7324_v38  ;;  %v871_v21 = vrot.slane %v6371_v20, %v7324_v38 }
 0x23f   :  { %v879_v22 = vrot.slane %v872_v11, %v7324_v38  ;;  %v887_v23 = vrot.slane %v6372_v12, %v7324_v38  ;;  %6693 = vmatprep.subr.mxu0 %v7122_v24  ;;  %v389_v27 = vrot.slane %v381_v13, %v7326_v47  ;;  %v396_v28 = vrot.slane %v382_v14, %v7326_v47 }
 0x240   :  { %v405_v29 = vrot.slane %v397_v17, %v7326_v47  ;;  %v412_v30 = vrot.slane %v398_v18, %v7326_v47  ;;  %v466_v32 = vcombine.high %v440_v50, %v448_v54  ;;  %v888_v33 = vcombine.low %v863_v19, %v871_v21 }
 0x241   :  { %v835_v34 = vrot.slane %v821_v44, %v7326_v47  ;;  %v485_v35 = vcombine.low %v389_v27, %v396_v28  ;;  %v6365_v36 = vcombine.high %v389_v27, %v396_v28  ;;  %v904_v40 = vcombine.low %v879_v22, %v887_v23 }
 0x242   :  { %v501_v37 = vcombine.low %v405_v29, %v412_v30  ;;  %v6366_v39 = vcombine.high %v405_v29, %v412_v30  ;;  %v851_v41 = vrot.slane %v837_v49, %v7326_v47  ;;  %v457_v42 = vrot.slane %v449_v55, %v7326_v47 }
 0x243   :  { %v473_v43 = vrot.slane %v465_v6, %v7326_v47  ;;  %v492_v45 = vrot.slane %v485_v35, %v7324_v38  ;;  %v500_v51 = vrot.slane %v6365_v36, %v7324_v38  ;;  %v464_v52 = vrot.slane %v450_v31, %v7326_v47 }
 0x244   :  { %v508_v46 = vrot.slane %v501_v37, %v7324_v38  ;;  %v516_v48 = vrot.slane %v6366_v39, %v7324_v38  ;;  %v854_v44 = vcombine.low %v835_v34, %v851_v41  ;;  %v480_v53 = vrot.slane %v466_v32, %v7326_v47 }
 0x245   :  { %v481_v50 = vcombine.low %v457_v42, %v473_v43  ;;  %v517_v54 = vcombine.low %v492_v45, %v500_v51  ;;  %v853_v56 = vcombine.high %v828_v0, %v844_v1  ;;  %v889_v55 = vcombine.high %v863_v19, %v871_v21 }
 0x246   :  { %v533_v49 = vcombine.low %v508_v46, %v516_v48  ;;  %6699 = vmatpush3.xpose.msk.msra.mxu1 %vm1295_vm4, %v854_v44  ;;  %v483_v57 = vcombine.low %v464_v52, %v480_v53  ;;  %v905_v58 = vcombine.high %v879_v22, %v887_v23  ;;  %v896_v59 = vrot.slane %v888_v33, %v7326_v47 }
 0x247   :  { %6691 = vmatmul.mubr.msk.f32.vlgmr.msra.gmra.mxu0 %vm1295_vm4, %v481_v50  ;;  %v912_v60 = vrot.slane %v904_v40, %v7326_v47  ;;  %v482_v61 = vcombine.high %v457_v42, %v473_v43  ;;  %6708 = vmatprep.subr.mxu1 %v7122_v24  ;;  %v525_v62 = vrot.slane %v517_v54, %v7326_v47 }
 0x248   :  { %6694 = vmatpush3.xpose.msk.msra.mxu0 %vm1295_vm4, %v853_v56  ;;  %6695 = vmatprep.mubr.msk.f32.mxu0 %vm7123_vm3, %v7122_v24  ;;  %v541_v63 = vrot.slane %v533_v49, %v7326_v47  ;;  %v855_v0 = vcombine.high %v835_v34, %v851_v41  ;;  %v518_v2 = vcombine.high %v492_v45, %v500_v51 }
 0x249   :  { %6703 = vmatprep.subr.mxu0 %v7122_v24  ;;  %6701 = vmatmul.mubr.msk.f32.vlgmr.msra.gmra.mxu1 %vm1295_vm4, %v483_v57  ;;  %v920_v1 = vcombine.low %v896_v59, %v912_v60  ;;  %v534_v3 = vcombine.high %v508_v46, %v516_v48  ;;  %v921_v4 = vcombine.high %v896_v59, %v912_v60  ;;  %v1006_v46 = vpop.permute.xlu1 %1005 }
 0x24a   :  { %6710 = vmatprep.mubr.msk.f32.mxu1 %vm7123_vm3, %v7122_v24  ;;  %v903_v5 = vrot.slane %v889_v55, %v7326_v47  ;;  %v919_v6 = vrot.slane %v905_v58, %v7326_v47  ;;  %v484_v7 = vcombine.high %v464_v52, %v480_v53  ;;  %v549_v8 = vcombine.low %v525_v62, %v541_v63 }
 0x24b   :  { %6696 = vmatmul.mubr.msk.f32.vlgmr.msra.gmra.mxu0 %vm1295_vm4, %v482_v61  ;;  %6709 = vmatpush3.xpose.msk.msra.mxu1 %vm1295_vm4, %v920_v1  ;;  %v550_v9 = vcombine.high %v525_v62, %v541_v63  ;;  %v532_v10 = vrot.slane %v518_v2, %v7326_v47  ;;  %v548_v20 = vrot.slane %v534_v3, %v7326_v47 }
 0x24c   :  { %6704 = vmatpush3.xpose.msk.msra.mxu0 %vm1295_vm4, %v855_v0  ;;  %6705 = vmatprep.mubr.msk.f32.mxu0 %vm7123_vm3, %v7122_v24  ;;  %v922_v11 = vcombine.low %v903_v5, %v919_v6  ;;  %v923_v12 = vcombine.high %v903_v5, %v919_v6 }
 0x24d   :  { %6713 = vmatprep.subr.mxu0 %v7122_v24  ;;  %6718 = vmatprep.subr.mxu1 %v7122_v24  ;;  %v551_v13 = vcombine.low %v532_v10, %v548_v20  ;;  %v552_v14 = vcombine.high %v532_v10, %v548_v20 }
 0x24e   :  { %6711 = vmatmul.mubr.msk.f32.vlgmr.msra.gmra.mxu1 %vm1295_vm4, %v549_v8 }
 0x24f   :  { %6706 = vmatmul.mubr.msk.f32.vlgmr.msra.gmra.mxu0 %vm1295_vm4, %v484_v7  ;;  %6719 = vmatpush3.xpose.msk.msra.mxu1 %vm1295_vm4, %v922_v11 }
 0x250   :  { %6714 = vmatpush3.xpose.msk.msra.mxu0 %vm1295_vm4, %v921_v4  ;;  %6715 = vmatprep.mubr.msk.f32.mxu0 %vm7123_vm3, %v7122_v24 }
 0x251   :  { %6723 = vmatprep.subr.mxu0 %v7122_v24  ;;  %6720 = vmatprep.mubr.msk.f32.mxu1 %vm7123_vm3, %v7122_v24 }
 0x252   :  { %6728 = vmatprep.subr.mxu1 %v7122_v24  ;;  %6721 = vmatmul.mubr.msk.f32.vlgmr.msra.gmra.mxu1 %vm1295_vm4, %v551_v13 }
 0x253   :  { %6716 = vmatmul.mubr.msk.f32.vlgmr.msra.gmra.mxu0 %vm1295_vm4, %v550_v9  ;;  %6730 = vmatprep.mubr.msk.f32.mxu1 %vm7123_vm3, %v7122_v24 }
 0x254   :  { %6724 = vmatpush3.xpose.msk.msra.mxu0 %vm1295_vm4, %v923_v12  ;;  %6725 = vmatprep.mubr.msk.f32.mxu0 %vm7123_vm3, %v7122_v24 }
 0x255   :  { %6733 = vmatprep.subr.mxu0 %v7122_v24 }
 0x257   :  { %6726 = vmatmul.mubr.msk.f32.vlgmr.msra.gmra.mxu0 %vm1295_vm4, %v552_v14 }
 0x258   :  { %6735 = vmatprep.mubr.msk.f32.mxu0 %vm7123_vm3, %v7122_v24 }
 0x307   :  { %v1368_v17 = vpop.f32.mrf.mxu0 }
 0x308   :  { %v1904_v18 = vsel %vm1295_vm4, %v1368_v17, -inf }
 0x309   :  { %1905 = vmax.xlane.f32.xlu0 %v1904_v18  ;;  %v6692_v19 = vpop.f32.mrf.mxu0  ;;  %v1520_v21 = vpop.f32.mrf.mxu1 }
 0x30a   :  { %v1910_v27 = vsel %vm1295_vm4, %v1520_v21, -inf }
 0x30b   :  { %v1444_v22 = vpop.f32.mrf.mxu0  ;;  %v6702_v23 = vpop.f32.mrf.mxu1 }
 0x30c   :  { %v1907_v28 = vsel %vm1295_vm4, %v1444_v22, -inf }
 0x30d   :  { %1911 = vmax.xlane.f32.xlu0 %v1910_v27  ;;  %1908 = vmax.xlane.f32.xlu1 %v1907_v28  ;;  %v6697_v29 = vpop.f32.mrf.mxu0 }
 0x30e   :  { %v1672_v33 = vpop.f32.mrf.mxu1 }
 0x30f   :  { %v1596_v30 = vpop.f32.mrf.mxu0  ;;  %v1916_v34 = vsel %vm1295_vm4, %v1672_v33, -inf }
 0x310   :  { %v1913_v31 = vsel %vm1295_vm4, %v1596_v30, -inf  ;;  %v6712_v36 = vpop.f32.mrf.mxu1 }
 0x311   :  { %1914 = vmax.xlane.f32.xlu0 %v1913_v31  ;;  %v6707_v32 = vpop.f32.mrf.mxu0  ;;  %1917 = vmax.xlane.f32.xlu1 %v1916_v34 }
 0x312   :  { %v1824_v40 = vpop.f32.mrf.mxu1 }
 0x313   :  { %v1748_v35 = vpop.f32.mrf.mxu0  ;;  %v1922_v41 = vsel %vm1295_vm4, %v1824_v40, -inf }
 0x314   :  { %v1919_v37 = vsel %vm1295_vm4, %v1748_v35, -inf  ;;  %v6722_v43 = vpop.f32.mrf.mxu1 }
 0x315   :  { %1920 = vmax.xlane.f32.xlu0 %v1919_v37  ;;  %v6717_v39 = vpop.f32.mrf.mxu0  ;;  %1923 = vmax.xlane.f32.xlu1 %v1922_v41 }
 0x317   :  { %v1900_v42 = vpop.f32.mrf.mxu0 }
 0x318   :  { %v1925_v45 = vsel %vm1295_vm4, %v1900_v42, -inf }
 0x319   :  { %1926 = vmax.xlane.f32.xlu0 %v1925_v45  ;;  %v6727_v51 = vpop.f32.mrf.mxu0 }
 0x326   :  { %1017 = vrot.lane.b32.xlu1 %v7314_v26, %s7120_s28 }
 0x32f   :  { %1011 = vrot.lane.b32.xlu0 %v7314_v26, %s7121_s29 }
 0x392   :  { %v1906_v48 = vpop.xlane.xlu0 %1905 }
 0x393   :  { %v1928_v44 = vsub.f32 %v1368_v17, %v1906_v48 }
 0x395   :  { %v1936_v50 = vmul.f32 1.442695, %v1928_v44 }
 0x396   :  { %v1909_v52 = vpop.xlane.xlu1 %1908  ;;  %v1912_v53 = vpop.xlane.xlu0 %1911 }
 0x397   :  { %6977 = vpow2.f32 %v1936_v50  ;;  %v1929_v54 = vsub.f32 %v1444_v22, %v1909_v52  ;;  %v1930_v49 = vsub.f32 %v1520_v21, %v1912_v53 }
 0x399   :  { %v1938_v56 = vmul.f32 1.442695, %v1929_v54  ;;  %v1940_v55 = vmul.f32 1.442695, %v1930_v49 }
 0x39a   :  { %v1915_v57 = vpop.xlane.xlu0 %1914  ;;  %v1918_v59 = vpop.xlane.xlu1 %1917 }
 0x39b   :  { %6979 = vpow2.f32 %v1938_v56  ;;  %v1931_v58 = vsub.f32 %v1596_v30, %v1915_v57  ;;  %v1932_v61 = vsub.f32 %v1672_v33, %v1918_v59 }
 0x39c   :  { %6981 = vpow2.f32 %v1940_v55 }
 0x39d   :  { %v1942_v60 = vmul.f32 1.442695, %v1931_v58  ;;  %v1944_v63 = vmul.f32 1.442695, %v1932_v61 }
 0x39e   :  { %v1921_v62 = vpop.xlane.xlu0 %1920  ;;  %v1924_v1 = vpop.xlane.xlu1 %1923 }
 0x39f   :  { %6983 = vpow2.f32 %v1942_v60  ;;  %v1933_v0 = vsub.f32 %v1748_v35, %v1921_v62  ;;  %v1934_v3 = vsub.f32 %v1824_v40, %v1924_v1 }
 0x3a0   :  { %6985 = vpow2.f32 %v1944_v63 }
 0x3a1   :  { %v1946_v2 = vmul.f32 1.442695, %v1933_v0  ;;  %v1948_v5 = vmul.f32 1.442695, %v1934_v3 }
 0x3a2   :  { %v1927_v4 = vpop.xlane.xlu0 %1926  ;;  %v1018_v8 = vpop.permute.xlu1 %1017 }
 0x3a3   :  { %6987 = vpow2.f32 %v1946_v2  ;;  %v1935_v6 = vsub.f32 %v1900_v42, %v1927_v4  ;;  %v1039_v10 = vcombine.low %v1006_v46, %v1018_v8  ;;  %v1040_v20 = vcombine.high %v1006_v46, %v1018_v8 }
 0x3a4   :  { %v7474_v7 = vpop.eup %6977  ;;  %6989 = vpow2.f32 %v1948_v5 }
 0x3a5   :  { %v1950_v9 = vmul.f32 1.442695, %v1935_v6  ;;  %v1952_v11 = vsel %vm1295_vm4, %v7474_v7, 0.0  ;;  %v1047_v13 = vrot.slane %v1039_v10, %v7324_v38  ;;  %v1054_v18 = vrot.slane %v1040_v20, %v7324_v38 }
 0x3a6   :  { %v1012_v12 = vpop.permute.xlu0 %1011  ;;  %1953 = vadd.xlane.f32.xlu1 %v1952_v11 }
 0x3a7   :  { %6991 = vpow2.f32 %v1950_v9  ;;  %v1023_v14 = vcombine.low %v7314_v26, %v1012_v12  ;;  %v1024_v19 = vcombine.high %v7314_v26, %v1012_v12 }
 0x3a8   :  { %v7480_v17 = vpop.eup %6979 }
 0x3a9   :  { %v7484_v21 = vpop.eup %6981  ;;  %v1031_v22 = vrot.slane %v1023_v14, %v7324_v38  ;;  %v1955_v23 = vsel %vm1295_vm4, %v7480_v17, 0.0  ;;  %v1038_v27 = vrot.slane %v1024_v19, %v7324_v38 }
 0x3aa   :  { %1956 = vadd.xlane.f32.xlu0 %v1955_v23  ;;  %v1958_v28 = vsel %vm1295_vm4, %v7484_v21, 0.0 }
 0x3ab   :  { %v1055_v29 = vcombine.low %v1031_v22, %v1047_v13  ;;  %v1056_v30 = vcombine.high %v1031_v22, %v1047_v13  ;;  %1959 = vadd.xlane.f32.xlu1 %v1958_v28  ;;  %v1071_v32 = vcombine.low %v1038_v27, %v1054_v18  ;;  %v1072_v26 = vcombine.high %v1038_v27, %v1054_v18 }
 0x3ac   :  { %v7492_v31 = vpop.eup %6983 }
 0x3ad   :  { %v1063_v33 = vrot.slane %v1055_v29, %v7326_v47  ;;  %v1070_v34 = vrot.slane %v1056_v30, %v7326_v47  ;;  %v1961_v35 = vsel %vm1295_vm4, %v7492_v31, 0.0  ;;  %v7498_v36 = vpop.eup %6985  ;;  %v1079_v37 = vrot.slane %v1071_v32, %v7326_v47 }
 0x3ae   :  { %v1086_v39 = vrot.slane %v1072_v26, %v7326_v47  ;;  %1962 = vadd.xlane.f32.xlu0 %v1961_v35  ;;  %v1964_v42 = vsel %vm1295_vm4, %v7498_v36, 0.0 }
 0x3af   :  { %v1159_v40 = vcombine.low %v1063_v33, %v1070_v34  ;;  %v6375_v41 = vcombine.high %v1063_v33, %v1070_v34  ;;  %1965 = vadd.xlane.f32.xlu1 %v1964_v42 }
 0x3b0   :  { %v7504_v43 = vpop.eup %6987  ;;  %v1175_v45 = vcombine.low %v1079_v37, %v1086_v39  ;;  %v6376_v51 = vcombine.high %v1079_v37, %v1086_v39 }
 0x3b1   :  { %v1166_v46 = vrot.slane %v1159_v40, %v7324_v38  ;;  %v1174_v48 = vrot.slane %v6375_v41, %v7324_v38  ;;  %v1967_v44 = vsel %vm1295_vm4, %v7504_v43, 0.0  ;;  %v7510_v50 = vpop.eup %6989 }
 0x3b2   :  { %v1182_v52 = vrot.slane %v1175_v45, %v7324_v38  ;;  %v1190_v53 = vrot.slane %v6376_v51, %v7324_v38  ;;  %1968 = vadd.xlane.f32.xlu0 %v1967_v44  ;;  %v1970_v54 = vsel %vm1295_vm4, %v7510_v50, 0.0 }
 0x3b3   :  { %v1191_v49 = vcombine.low %v1166_v46, %v1174_v48  ;;  %v1192_v56 = vcombine.high %v1166_v46, %v1174_v48  ;;  %1971 = vadd.xlane.f32.xlu1 %v1970_v54 }
 0x3b4   :  { %v7516_v55 = vpop.eup %6991  ;;  %v1207_v57 = vcombine.low %v1182_v52, %v1190_v53  ;;  %v1208_v58 = vcombine.high %v1182_v52, %v1190_v53 }
 0x3b5   :  { %v1973_v59 = vsel %vm1295_vm4, %v7516_v55, 0.0  ;;  %v1199_v60 = vrot.slane %v1191_v49, %v7326_v47  ;;  %v1206_v61 = vrot.slane %v1192_v56, %v7326_v47 }
 0x3b6   :  { %1974 = vadd.xlane.f32.xlu0 %v1973_v59  ;;  %v1215_v62 = vrot.slane %v1207_v57, %v7326_v47  ;;  %v1222_v63 = vrot.slane %v1208_v58, %v7326_v47 }
 0x3b8   :  { %v1223_v0 = vcombine.low %v1199_v60, %v1215_v62  ;;  %v1224_v1 = vcombine.high %v1199_v60, %v1215_v62  ;;  %v1225_v2 = vcombine.low %v1206_v61, %v1222_v63  ;;  %v1226_v3 = vcombine.high %v1206_v61, %v1222_v63 }
 0x3ba   :  { %6729 = vmatpush3.msra.mxu1 %v1223_v0  ;;  %6734 = vmatpush3.msra.mxu0 %v1224_v1 }
 0x3bb   :  { %6738 = vmatprep.subr.mxu1 %v7122_v24  ;;  %6743 = vmatprep.subr.mxu0 %v7122_v24 }
 0x3c4   :  { %1013 = vrot.lane.b32.xlu1 %v7308_v25, %s7121_s29 }
 0x3c8   :  { %1019 = vrot.lane.b32.xlu1 %v7308_v25, %s7120_s28 }
 0x3cc   :  { %1007 = vrot.lane.b32.xlu0 %v7308_v25, %s7119_s27 }
 0x42f   :  { %v1954_v4 = vpop.xlane.xlu1 %1953 }
 0x430   :  { %6993 = vrcp.f32 %v1954_v4 }
 0x433   :  { %v1957_v5 = vpop.xlane.xlu0 %1956 }
 0x434   :  { %v1960_v6 = vpop.xlane.xlu1 %1959  ;;  %6995 = vrcp.f32 %v1957_v5 }
 0x435   :  { %6997 = vrcp.f32 %v1960_v6 }
 0x437   :  { %v1963_v8 = vpop.xlane.xlu0 %1962 }
 0x438   :  { %6999 = vrcp.f32 %v1963_v8  ;;  %v1966_v9 = vpop.xlane.xlu1 %1965 }
 0x439   :  { %7001 = vrcp.f32 %v1966_v9 }
 0x43b   :  { %v1969_v10 = vpop.xlane.xlu0 %1968 }
 0x43c   :  { %v1972_v20 = vpop.xlane.xlu1 %1971  ;;  %7003 = vrcp.f32 %v1969_v10 }
 0x43d   :  { %v6994_v11 = vpop.eup %6993  ;;  %7005 = vrcp.f32 %v1972_v20 }
 0x43e   :  { %v1977_v13 = vmul.f32 %v6994_v11, %v7474_v7 }
 0x43f   :  { %v1975_v12 = vpop.xlane.xlu0 %1974 }
 0x440   :  { %6731 = vmatmul.mubr.msk.f32.vlgmr.msra.gmra.mxu1 %vm1295_vm4, %v1977_v13  ;;  %v1014_v18 = vpop.permute.xlu1 %1013  ;;  %7007 = vrcp.f32 %v1975_v12 }
 0x441   :  { %v6996_v14 = vpop.eup %6995  ;;  %6739 = vmatpush3.msra.mxu1 %v1225_v2  ;;  %6740 = vmatprep.mubr.msk.f32.mxu1 %vm7123_vm3, %v7122_v24  ;;  %v1091_v27 = vcombine.low %v7308_v25, %v1014_v18  ;;  %v1092_v28 = vcombine.high %v7308_v25, %v1014_v18 }
 0x442   :  { %v6998_v19 = vpop.eup %6997  ;;  %v1979_v22 = vmul.f32 %v6996_v14, %v7480_v17  ;;  %6748 = vmatprep.subr.mxu1 %v7122_v24 }
 0x443   :  { %v1981_v23 = vmul.f32 %v6998_v19, %v7484_v21  ;;  %v1008_v29 = vpop.permute.xlu0 %1007  ;;  %v1099_v25 = vrot.slane %v1091_v27, %v7324_v38  ;;  %v1106_v21 = vrot.slane %v1092_v28, %v7324_v38 }
 0x444   :  { %6736 = vmatmul.mubr.msk.f32.vlgmr.msra.gmra.mxu0 %vm1295_vm4, %v1979_v22  ;;  %v1020_v30 = vpop.permute.xlu1 %1019 }
 0x445   :  { %v7000_v7 = vpop.eup %6999  ;;  %6741 = vmatmul.mubr.msk.f32.vlgmr.msra.gmra.mxu1 %vm1295_vm4, %v1981_v23  ;;  %6744 = vmatpush3.msra.mxu0 %v1226_v3  ;;  %v1107_v32 = vcombine.low %v1008_v29, %v1020_v30  ;;  %v1108_v26 = vcombine.high %v1008_v29, %v1020_v30 }
 0x446   :  { %6745 = vmatprep.mubr.msk.f32.mxu0 %vm7123_vm3, %v7122_v24  ;;  %v1983_v17 = vmul.f32 %v7000_v7, %v7492_v31  ;;  %6753 = vmatprep.subr.mxu0 %v7122_v24  ;;  %v7002_v60 = vpop.eup %7001 }
 0x447   :  { %6750 = vmatprep.mubr.msk.f32.mxu1 %vm7123_vm3, %v7122_v24  ;;  %v1115_v33 = vrot.slane %v1107_v32, %v7324_v38  ;;  %v1122_v34 = vrot.slane %v1108_v26, %v7324_v38  ;;  %v1985_v5 = vmul.f32 %v7002_v60, %v7498_v36 }
 0x448   :  { %6746 = vmatmul.mubr.msk.f32.vlgmr.msra.gmra.mxu0 %vm1295_vm4, %v1983_v17 }
 0x449   :  { %6755 = vmatprep.mubr.msk.f32.mxu0 %vm7123_vm3, %v7122_v24  ;;  %v1123_v31 = vcombine.low %v1099_v25, %v1115_v33  ;;  %v1124_v35 = vcombine.high %v1099_v25, %v1115_v33  ;;  %v1139_v37 = vcombine.low %v1106_v21, %v1122_v34  ;;  %v1140_v39 = vcombine.high %v1106_v21, %v1122_v34  ;;  %v7004_v61 = vpop.eup %7003 }
 0x44a   :  { %v7006_v2 = vpop.eup %7005  ;;  %v1987_v6 = vmul.f32 %v7004_v61, %v7504_v43 }
 0x44b   :  { %v1131_v40 = vrot.slane %v1123_v31, %v7326_v47  ;;  %v1138_v41 = vrot.slane %v1124_v35, %v7326_v47  ;;  %v1147_v42 = vrot.slane %v1139_v37, %v7326_v47  ;;  %v1154_v45 = vrot.slane %v1140_v39, %v7326_v47 }
 0x44c   :  { %v1989_v20 = vmul.f32 %v7006_v2, %v7510_v50 }
 0x44d   :  { %v1227_v51 = vcombine.low %v1131_v40, %v1138_v41  ;;  %v6377_v46 = vcombine.high %v1131_v40, %v1138_v41  ;;  %v1243_v48 = vcombine.low %v1147_v42, %v1154_v45  ;;  %v6378_v44 = vcombine.high %v1147_v42, %v1154_v45  ;;  %v7008_v8 = vpop.eup %7007 }
 0x44e   :  { %v1991_v36 = vmul.f32 %v7008_v8, %v7516_v55 }
 0x44f   :  { %v1234_v52 = vrot.slane %v1227_v51, %v7324_v38  ;;  %v1242_v53 = vrot.slane %v6377_v46, %v7324_v38  ;;  %v1250_v54 = vrot.slane %v1243_v48, %v7324_v38  ;;  %v1258_v49 = vrot.slane %v6378_v44, %v7324_v38 }
 0x451   :  { %v1259_v56 = vcombine.low %v1234_v52, %v1242_v53  ;;  %v1275_v57 = vcombine.low %v1250_v54, %v1258_v49  ;;  %v1260_v58 = vcombine.high %v1234_v52, %v1242_v53  ;;  %v1276_v59 = vcombine.high %v1250_v54, %v1258_v49 }
 0x453   :  { %v1267_v62 = vrot.slane %v1259_v56, %v7326_v47  ;;  %v1283_v63 = vrot.slane %v1275_v57, %v7326_v47  ;;  %v1274_v0 = vrot.slane %v1260_v58, %v7326_v47  ;;  %v1290_v1 = vrot.slane %v1276_v59, %v7326_v47 }
 0x455   :  { %v1291_v3 = vcombine.low %v1267_v62, %v1283_v63  ;;  %v1292_v4 = vcombine.high %v1267_v62, %v1283_v63  ;;  %v1293_v9 = vcombine.low %v1274_v0, %v1290_v1  ;;  %v1294_v10 = vcombine.high %v1274_v0, %v1290_v1 }
 0x457   :  { %6749 = vmatpush3.msra.mxu1 %v1291_v3  ;;  %6754 = vmatpush3.msra.mxu0 %v1292_v4 }
 0x458   :  { %6751 = vmatmul.mubr.msk.f32.vlgmr.msra.gmra.mxu1 %vm1295_vm4, %v1985_v5  ;;  %6756 = vmatmul.mubr.msk.f32.vlgmr.msra.gmra.mxu0 %vm1295_vm4, %v1987_v6 }
 0x459   :  { %6758 = vmatprep.subr.mxu1 %v7122_v24  ;;  %6763 = vmatprep.subr.mxu0 %v7122_v24 }
 0x45a   :  { %6759 = vmatpush3.msra.mxu1 %v1293_v9  ;;  %6764 = vmatpush3.msra.mxu0 %v1294_v10 }
 0x45b   :  { %6760 = vmatprep.mubr.msk.f32.mxu1 %vm7123_vm3, %v7122_v24  ;;  %6765 = vmatprep.mubr.msk.f32.mxu0 %vm7123_vm3, %v7122_v24 }
 0x45c   :  { %6761 = vmatmul.mubr.msk.f32.vlgmr.msra.gmra.mxu1 %vm1295_vm4, %v1989_v20  ;;  %6766 = vmatmul.mubr.msk.f32.vlgmr.msra.gmra.mxu0 %vm1295_vm4, %v1991_v36 }
 0x500   :  { %v2061_v43 = vpop.f32.mrf.mxu1 }
 0x502   :  { %v6732_v11 = vpop.f32.mrf.mxu1 }
 0x504   :  { %v2134_v12 = vpop.f32.mrf.mxu0 }
 0x505   :  { %v2207_v13 = vpop.f32.mrf.mxu1 }
 0x506   :  { %v6737_v14 = vpop.f32.mrf.mxu0  ;;  %v2576_v18 = vcombine.low %v2061_v43, %v2207_v13  ;;  %v2577_v19 = vcombine.high %v2061_v43, %v2207_v13 }
 0x507   :  { %v6742_v50 = vpop.f32.mrf.mxu1 }
 0x508   :  { %v2280_v22 = vpop.f32.mrf.mxu0  ;;  %v2584_v28 = vrot.slane %v2576_v18, %v7324_v38  ;;  %v2591_v7 = vrot.slane %v2577_v19, %v7324_v38  ;;  %v2883_v18 = vld [vmem:[#allocation2 + $0x18] sm:$0xff]  ;;  %v2882_v19 = vld [vmem:[#allocation2 + $0x10] sm:$0xff] }
 0x509   :  { %v2592_v55 = vcombine.low %v2134_v12, %v2280_v22  ;;  %v2593_v23 = vcombine.high %v2134_v12, %v2280_v22  ;;  %6768 = vmatprep.subr.mxu1 %v2883_v18 }
 0x50a   :  { %v6747_v27 = vpop.f32.mrf.mxu0  ;;  %6769 = vmatpush3.msra.mxu1 %v2883_v18 }
 0x50b   :  { %v2600_v29 = vrot.slane %v2592_v55, %v7324_v38  ;;  %v2607_v30 = vrot.slane %v2593_v23, %v7324_v38  ;;  %6770 = vmatprep.subr.mxu1 %v2882_v19 }
 0x50c   :  { %6771 = vmatpush3.msra.mxu1 %v2882_v19 }
 0x50d   :  { %v2608_v32 = vcombine.low %v2584_v28, %v2600_v29  ;;  %v2609_v26 = vcombine.high %v2584_v28, %v2600_v29  ;;  %v2624_v17 = vcombine.low %v2591_v7, %v2607_v30  ;;  %v2625_v25 = vcombine.high %v2591_v7, %v2607_v30  ;;  %v2881_v30 = vld [vmem:[#allocation2 + $0x8] sm:$0xff] }
 0x50e   :  { %6772 = vmatprep.subr.mxu1 %v2881_v30 }
 0x50f   :  { %v2616_v21 = vrot.slane %v2608_v32, %v7326_v47  ;;  %v2623_v33 = vrot.slane %v2609_v26, %v7326_v47  ;;  %v2632_v34 = vrot.slane %v2624_v17, %v7326_v47  ;;  %v2639_v31 = vrot.slane %v2625_v25, %v7326_v47  ;;  %v2880_v32 = vld [vmem:[#allocation2] sm:$0xff]  ;;  %6773 = vmatpush3.msra.mxu1 %v2881_v30 }
 0x510   :  { %6774 = vmatprep.subr.mxu1 %v2880_v32 }
 0x511   :  { %v2712_v35 = vcombine.low %v2616_v21, %v2623_v33  ;;  %v6403_v37 = vcombine.high %v2616_v21, %v2623_v33  ;;  %v2728_v39 = vcombine.low %v2632_v34, %v2639_v31  ;;  %v6404_v40 = vcombine.high %v2632_v34, %v2639_v31  ;;  %6775 = vmatpush3.msra.mxu1 %v2880_v32 }
 0x513   :  { %v2719_v41 = vrot.slane %v2712_v35, %v7324_v38  ;;  %v2727_v42 = vrot.slane %v6403_v37, %v7324_v38  ;;  %v2735_v45 = vrot.slane %v2728_v39, %v7324_v38  ;;  %v2743_v51 = vrot.slane %v6404_v40, %v7324_v38 }
 0x515   :  { %v2744_v46 = vcombine.low %v2719_v41, %v2727_v42  ;;  %v2760_v48 = vcombine.low %v2735_v45, %v2743_v51  ;;  %v2745_v44 = vcombine.high %v2719_v41, %v2727_v42  ;;  %v2761_v52 = vcombine.high %v2735_v45, %v2743_v51 }
 0x517   :  { %v7595_v53 = vrot.slane %v2744_v46, %v7326_v47  ;;  %v7598_v54 = vrot.slane %v2760_v48, %v7326_v47  ;;  %v2759_v59 = vrot.slane %v2745_v44, %v7326_v47  ;;  %v2775_v60 = vrot.slane %v2761_v52, %v7326_v47 }
 0x518   :  { %v2353_v57 = vpop.f32.mrf.mxu1  ;;  %v2426_v58 = vpop.f32.mrf.mxu0 }
 0x519   :  { %v2777_v49 = vcombine.high %v7595_v53, %v7598_v54  ;;  %v2776_v56 = vcombine.low %v7595_v53, %v7598_v54  ;;  %v2778_v63 = vcombine.low %v2759_v59, %v2775_v60  ;;  %v2779_v43 = vcombine.high %v2759_v59, %v2775_v60  ;;  %v3017_v53 = vld [vmem:[#allocation5 + $0x18] sm:$0xff]  ;;  %v3016_v54 = vld [vmem:[#allocation5 + $0x10] sm:$0xff] }
 0x51a   :  { %v6752_v61 = vpop.f32.mrf.mxu1  ;;  %v6757_v62 = vpop.f32.mrf.mxu0  ;;  %6779 = vmatprep.subr.mxu0 %v3017_v53 }
 0x51b   :  { %2850 = vrot.lane.b32.xlu0 %v2777_v49, %s7117_s22  ;;  %6780 = vmatpush3.msra.mxu0 %v3017_v53  ;;  %v6420_v53 = vld [vmem:[%s8157_s3 + $0x28] sm:$0xff] }
 0x51c   :  { %v2499_v0 = vpop.f32.mrf.mxu1  ;;  %v2572_v1 = vpop.f32.mrf.mxu0  ;;  %6781 = vmatprep.subr.mxu0 %v3016_v54 }
 0x51d   :  { %v2644_v2 = vcombine.low %v2353_v57, %v2499_v0  ;;  %v2645_v3 = vcombine.high %v2353_v57, %v2499_v0  ;;  %v2660_v4 = vcombine.low %v2426_v58, %v2572_v1  ;;  %v2661_v5 = vcombine.high %v2426_v58, %v2572_v1  ;;  %6782 = vmatpush3.msra.mxu0 %v3016_v54  ;;  %v3014_v1 = vld [vmem:[#allocation5] sm:$0xff]  ;;  %v6440_v54 = vld [vmem:[%s8159_s5 + $0x28] sm:$0xff] }
 0x51e   :  { %v6762_v6 = vpop.f32.mrf.mxu1  ;;  %v6767_v8 = vpop.f32.mrf.mxu0 }
 0x51f   :  { %2858 = vrot.lane.b32.xlu0 %v2778_v63, %s7126_s6  ;;  %v2652_v9 = vrot.slane %v2644_v2, %v7324_v38  ;;  %v2659_v10 = vrot.slane %v2645_v3, %v7324_v38  ;;  %v2668_v20 = vrot.slane %v2660_v4, %v7324_v38  ;;  %v2675_v36 = vrot.slane %v2661_v5, %v7324_v38  ;;  %v3115_v2 = vld [vmem:[%s8165_s11 + $0x38] sm:$0xff]  ;;  %v3114_v3 = vld [vmem:[%s8165_s11 + $0x30] sm:$0xff]  ;;  %v3113_v4 = vld [vmem:[%s8165_s11 + $0x28] sm:$0xff] }
 0x520   :  { %6790 = vmatprep.subr.mxu1 %v3115_v2  ;;  %v3112_v5 = vld [vmem:[%s8165_s11 + $0x20] sm:$0xff] }
 0x521   :  { %v2676_v11 = vcombine.low %v2652_v9, %v2668_v20  ;;  %v2677_v12 = vcombine.high %v2652_v9, %v2668_v20  ;;  %v2692_v13 = vcombine.low %v2659_v10, %v2675_v36  ;;  %v2693_v14 = vcombine.high %v2659_v10, %v2675_v36 }
 0x523   :  { %2866 = vrot.lane.b32.xlu0 %v2779_v43, %s7127_s30  ;;  %v2684_v50 = vrot.slane %v2676_v11, %v7326_v47  ;;  %v2691_v22 = vrot.slane %v2677_v12, %v7326_v47  ;;  %v2700_v55 = vrot.slane %v2692_v13, %v7326_v47  ;;  %v2707_v23 = vrot.slane %v2693_v14, %v7326_v47 }
 0x525   :  { %v2780_v27 = vcombine.low %v2684_v50, %v2691_v22  ;;  %v6405_v28 = vcombine.high %v2684_v50, %v2691_v22  ;;  %v2796_v7 = vcombine.low %v2700_v55, %v2707_v23  ;;  %v6406_v29 = vcombine.high %v2700_v55, %v2707_v23 }
 0x527   :  { %v2787_v26 = vrot.slane %v2780_v27, %v7324_v38  ;;  %v2795_v17 = vrot.slane %v6405_v28, %v7324_v38  ;;  %v2803_v25 = vrot.slane %v2796_v7, %v7324_v38  ;;  %v2811_v21 = vrot.slane %v6406_v29, %v7324_v38 }
 0x529   :  { %v2812_v33 = vcombine.low %v2787_v26, %v2795_v17  ;;  %v2828_v34 = vcombine.low %v2803_v25, %v2811_v21  ;;  %v2813_v31 = vcombine.high %v2787_v26, %v2795_v17  ;;  %v2829_v35 = vcombine.high %v2803_v25, %v2811_v21 }
 0x52b   :  { %v2820_v37 = vrot.slane %v2812_v33, %v7326_v47  ;;  %v2836_v39 = vrot.slane %v2828_v34, %v7326_v47  ;;  %v2827_v42 = vrot.slane %v2813_v31, %v7326_v47  ;;  %v2843_v45 = vrot.slane %v2829_v35, %v7326_v47  ;;  %v6409_v34 = vld [vmem:[%s8161_s7] ss:$0 sm:$0xff] }
 0x52d   :  { %v2845_v40 = vcombine.high %v2820_v37, %v2836_v39  ;;  %v2844_v41 = vcombine.low %v2820_v37, %v2836_v39  ;;  %v2846_v51 = vcombine.low %v2827_v42, %v2843_v45  ;;  %v2847_v46 = vcombine.high %v2827_v42, %v2843_v45  ;;  %v6410_v37 = vld [vmem:[%s8162_s8] ss:$0 sm:$0xff]  ;;  %v3111_v45 = vld [vmem:[%s8165_s11 + $0x18] sm:$0xff] }
 0x52f   :  { %2852 = vrot.lane.b32.xlu1 %v2845_v40, %s7117_s22 }
 0x533   :  { %2860 = vrot.lane.b32.xlu1 %v2846_v51, %s7126_s6  ;;  %v3110_v51 = vld [vmem:[%s8165_s11 + $0x10] sm:$0xff] }
 0x537   :  { %2868 = vrot.lane.b32.xlu1 %v2847_v46, %s7127_s30  ;;  %v3109_v46 = vld [vmem:[%s8165_s11 + $0x8] sm:$0xff] }
 0x58d   :  { %v2851_v48 = vpop.permute.xlu0 %2850 }
 0x58e   :  { %v2872_v52 = vsel %vm1295_vm4, %v2776_v56, %v2851_v48  ;;  %v3015_v56 = vld [vmem:[#allocation5 + $0x8] sm:$0xff]  ;;  %v3108_v48 = vld [vmem:[%s8165_s11] sm:$0xff] }
 0x58f   :  { %6783 = vmatprep.subr.mxu0 %v3015_v56 }
 0x590   :  { %6784 = vmatpush3.msra.mxu0 %v3015_v56  ;;  %v6419_v56 = vld [vmem:[%s8157_s3 + $0x20] sm:$0xff] }
 0x591   :  { %v2859_v44 = vpop.permute.xlu0 %2858  ;;  %6785 = vmatprep.subr.mxu0 %v3014_v1 }
 0x592   :  { %v2875_v49 = vsel %vm2874_vm5, %v2872_v52, %v2859_v44  ;;  %6786 = vmatpush3.msra.mxu0 %v3014_v1  ;;  %v6411_v44 = vld [vmem:[%s8164_s10] ss:$0 sm:$0xff] }
 0x593   :  { %v6439_v1 = vld [vmem:[%s8159_s5 + $0x20] sm:$0xff] }
 0x595   :  { %v2867_v57 = vpop.permute.xlu0 %2866 }
 0x596   :  { %v2878_v58 = vsel %vm2877_vm6, %v2875_v49, %v2867_v57 }
 0x597   :  { %6776 = vmatprep.mubr.msk.f32.mxu1 %vm179_vm2, %v2878_v58 }
 0x5a1   :  { %v2853_v59 = vpop.permute.xlu1 %2852 }
 0x5a2   :  { %v2873_v61 = vsel %vm1295_vm4, %v2844_v41, %v2853_v59 }
 0x5a5   :  { %v2861_v60 = vpop.permute.xlu1 %2860 }
 0x5a6   :  { %v2876_v62 = vsel %vm2874_vm5, %v2873_v61, %v2861_v60  ;;  %v6422_v61 = vld [vmem:[%s8157_s3 + $0x38] sm:$0xff] }
 0x5a7   :  { %6809 = vmatprep.subr.mxu0 %v6422_v61 }
 0x5a9   :  { %v2869_v63 = vpop.permute.xlu1 %2868 }
 0x5aa   :  { %v2879_v0 = vsel %vm2877_vm6, %v2876_v62, %v2869_v63  ;;  %v6442_v62 = vld [vmem:[%s8159_s5 + $0x38] sm:$0xff]  ;;  %v6421_v63 = vld [vmem:[%s8157_s3 + $0x30] sm:$0xff] }
 0x5ab   :  { %6777 = vmatmul.mubr.msk.f32.vlgmr.msra.gmra.mxu1 %vm179_vm2, %v2879_v0  ;;  %v6441_v0 = vld [vmem:[%s8159_s5 + $0x30] sm:$0xff] }
 0x5ac   :  { %6791 = vmatpush3.msra.mxu1 %v3115_v2  ;;  %v6432_v2 = vld [vmem:[%s8158_s4 + $0x38] sm:$0xff] }
 0x5ad   :  { %6792 = vmatprep.subr.mxu1 %v3114_v3 }
 0x5ae   :  { %6793 = vmatpush3.msra.mxu1 %v3114_v3  ;;  %v6414_v3 = vld [vmem:[%s8166_s12] ss:$0 sm:$0xff] }
 0x5af   :  { %6794 = vmatprep.subr.mxu1 %v3113_v4 }
 0x5b0   :  { %6795 = vmatpush3.msra.mxu1 %v3113_v4 }
 0x5b1   :  { %6796 = vmatprep.subr.mxu1 %v3112_v5 }
 0x5b2   :  { %6797 = vmatpush3.msra.mxu1 %v3112_v5 }
 0x5b3   :  { %6798 = vmatprep.subr.mxu1 %v3111_v45 }
 0x5b4   :  { %6799 = vmatpush3.msra.mxu1 %v3111_v45  ;;  %v6431_v45 = vld [vmem:[%s8158_s4 + $0x30] sm:$0xff] }
 0x5b5   :  { %6800 = vmatprep.subr.mxu1 %v3110_v51 }
 0x5b6   :  { %6801 = vmatpush3.msra.mxu1 %v3110_v51  ;;  %v6430_v51 = vld [vmem:[%s8158_s4 + $0x28] sm:$0xff] }
 0x5b7   :  { %6802 = vmatprep.subr.mxu1 %v3109_v46 }
 0x5b8   :  { %6803 = vmatpush3.msra.mxu1 %v3109_v46  ;;  %v6429_v46 = vld [vmem:[%s8158_s4 + $0x20] sm:$0xff] }
 0x5b9   :  { %6804 = vmatprep.subr.mxu1 %v3108_v48 }
 0x5ba   :  { %6805 = vmatpush3.msra.mxu1 %v3108_v48 }
 0x5bb   :  { %6831 = vmatprep.subr.mxu1 %v6442_v62 }
 0x66b   :  { %v6778_v6 = vpop.f32.mrf.mxu1 }
 0x66c   :  { %v2966_v8 = vadd.f32 %v6778_v6, %v7262_v16 }
 0x66d   :  { %v2956_v9 = vpop.f32.mrf.mxu1 }
 0x66e   :  { %v2965_v10 = vadd.f32 %v2956_v9, %v7260_v15  ;;  %v2970_v20 = vsel %vm179_vm2, %v2966_v8, 0.0 }
 0x670   :  { %v2969_v36 = vsel %vm179_vm2, %v2965_v10, 0.0 }
 0x671   :  { %v2971_v43 = vadd.f32 %v2970_v20, %v2969_v36 }
 0x673   :  { %v2972_v11 = vrot.slane %v2971_v43, 4 }
 0x675   :  { %v2973_v12 = vadd.f32 %v2972_v11, %v2971_v43 }
 0x677   :  { %v2974_v13 = vrot.slane %v2973_v12, 2 }
 0x679   :  { %v2975_v14 = vadd.f32 %v2974_v13, %v2973_v12 }
 0x67b   :  { %v2976_v18 = vrot.slane %v2975_v14, 1 }
 0x67d   :  { %v2977_v19 = vadd.f32 %v2976_v18, %v2975_v14 }
 0x67f   :  { %v2979_v50 = vmul.f32 0.0625, %v2977_v19 }
 0x681   :  { %v2980_v22 = vsub.f32 %v2965_v10, %v2979_v50  ;;  %v2981_v55 = vsub.f32 %v2966_v8, %v2979_v50 }
 0x683   :  { %v2982_v23 = vmul.f32 %v2980_v22, %v2980_v22  ;;  %v2983_v27 = vmul.f32 %v2981_v55, %v2981_v55 }
 0x685   :  { %v2984_v16 = vsel %vm179_vm2, %v2982_v23, 0.0  ;;  %v2985_v15 = vsel %vm179_vm2, %v2983_v27, 0.0 }
 0x686   :  { %v2986_v28 = vadd.f32 %v2985_v15, %v2984_v16 }
 0x688   :  { %v2987_v7 = vrot.slane %v2986_v28, 4 }
 0x68a   :  { %v2988_v29 = vadd.f32 %v2987_v7, %v2986_v28 }
 0x68c   :  { %v2989_v30 = vrot.slane %v2988_v29, 2 }
 0x68e   :  { %v2990_v32 = vadd.f32 %v2989_v30, %v2988_v29 }
 0x690   :  { %v2991_v26 = vrot.slane %v2990_v32, 1 }
 0x692   :  { %v2992_v17 = vadd.f32 %v2991_v26, %v2990_v32 }
 0x694   :  { %v2993_v25 = vmul.f32 0.0625, %v2992_v17 }
 0x696   :  { %v2994_v21 = vadd.f32 1e-05, %v2993_v25 }
 0x698   :  { %7009 = vrsqrt.f32 %v2994_v21 }
 0x6a5   :  { %v7010_v33 = vpop.eup %7009 }
 0x6a6   :  { %v2996_v31 = vmul.f32 %v7010_v33, %v2980_v22  ;;  %v2997_v35 = vmul.f32 %v7010_v33, %v2981_v55 }
 0x6a8   :  { %v3004_v39 = vmul.f32 %v6409_v34, %v2996_v31  ;;  %v3005_v40 = vmul.f32 %v6409_v34, %v2997_v35  ;;  %v6417_v34 = vld [vmem:[%s8167_s13] ss:$0 sm:$0xff] }
 0x6aa   :  { %v3012_v41 = vadd.f32 %v6410_v37, %v3004_v39  ;;  %v3013_v42 = vadd.f32 %v6410_v37, %v3005_v40  ;;  %v6418_v37 = vld [vmem:[%s8168_s14] ss:$0 sm:$0xff] }
 0x6ac   :  { %6787 = vmatprep.mubr.msk.f32.mxu0 %vm179_vm2, %v3012_v41 }
 0x6ad   :  { %6788 = vmatmul.mubr.msk.f32.vlgmr.msra.gmra.mxu0 %vm179_vm2, %v3013_v42 }
 0x6ae   :  { %6810 = vmatpush3.msra.mxu0 %v6422_v61 }
 0x6af   :  { %6811 = vmatprep.subr.mxu0 %v6421_v63 }
 0x6b0   :  { %6812 = vmatpush3.msra.mxu0 %v6421_v63 }
 0x6b1   :  { %6813 = vmatprep.subr.mxu0 %v6420_v53 }
 0x6b2   :  { %6814 = vmatpush3.msra.mxu0 %v6420_v53 }
 0x6b3   :  { %6815 = vmatprep.subr.mxu0 %v6419_v56 }
 0x6b4   :  { %6816 = vmatpush3.msra.mxu0 %v6419_v56 }
 0x6b5   :  { %6820 = vmatprep.subr.mxu0 %v6432_v2 }
 0x76d   :  { %v6789_v52 = vpop.f32.mrf.mxu0 }
 0x76e   :  { %v3103_v49 = vadd.f32 %v6789_v52, %v6411_v44 }
 0x76f   :  { %v3097_v57 = vpop.f32.mrf.mxu0 }
 0x770   :  { %v3098_v58 = vadd.f32 %v6411_v44, %v3097_v57  ;;  %v3107_v60 = vmax.f32 %v3103_v49, 0.0 }
 0x772   :  { %v3106_v59 = vmax.f32 %v3098_v58, 0.0 }
 0x774   :  { %6806 = vmatprep.mubr.msk.f32.mxu1 %vm3123_vm7, %v3106_v59 }
 0x775   :  { %6807 = vmatmul.mubr.msk.f32.vlgmr.msra.gmra.mxu1 %vm3123_vm7, %v3107_v60 }
 0x776   :  { %6832 = vmatpush3.msra.mxu1 %v6442_v62 }
 0x777   :  { %6833 = vmatprep.subr.mxu1 %v6441_v0 }
 0x778   :  { %6834 = vmatpush3.msra.mxu1 %v6441_v0 }
 0x779   :  { %6835 = vmatprep.subr.mxu1 %v6440_v54 }
 0x77a   :  { %6836 = vmatpush3.msra.mxu1 %v6440_v54 }
 0x77b   :  { %6837 = vmatprep.subr.mxu1 %v6439_v1 }
 0x77c   :  { %6838 = vmatpush3.msra.mxu1 %v6439_v1 }
 0x77d   :  { %6852 = vmatprep.subr.mxu1 %v7122_v24 }
 0x835   :  { %v6808_v4 = vpop.f32.mrf.mxu1 }
 0x836   :  { %v3202_v5 = vadd.f32 %v6808_v4, %v6414_v3 }
 0x837   :  { %v3196_v6 = vpop.f32.mrf.mxu1 }
 0x838   :  { %v3206_v8 = vadd.f32 %v3202_v5, %v3013_v42  ;;  %v3197_v9 = vadd.f32 %v6414_v3, %v3196_v6 }
 0x83a   :  { %v3205_v10 = vadd.f32 %v3197_v9, %v3012_v41  ;;  %v3210_v20 = vsel %vm179_vm2, %v3206_v8, 0.0 }
 0x83c   :  { %v3209_v36 = vsel %vm179_vm2, %v3205_v10, 0.0 }
 0x83d   :  { %v3211_v43 = vadd.f32 %v3210_v20, %v3209_v36 }
 0x83f   :  { %v3212_v11 = vrot.slane %v3211_v43, 4 }
 0x841   :  { %v3213_v12 = vadd.f32 %v3212_v11, %v3211_v43 }
 0x843   :  { %v3214_v13 = vrot.slane %v3213_v12, 2 }
 0x845   :  { %v3215_v14 = vadd.f32 %v3214_v13, %v3213_v12 }
 0x847   :  { %v3216_v18 = vrot.slane %v3215_v14, 1 }
 0x849   :  { %v3217_v19 = vadd.f32 %v3216_v18, %v3215_v14 }
 0x84b   :  { %v3218_v50 = vmul.f32 0.0625, %v3217_v19 }
 0x84d   :  { %v3219_v22 = vsub.f32 %v3205_v10, %v3218_v50  ;;  %v3220_v55 = vsub.f32 %v3206_v8, %v3218_v50 }
 0x84f   :  { %v3221_v23 = vmul.f32 %v3219_v22, %v3219_v22  ;;  %v3222_v27 = vmul.f32 %v3220_v55, %v3220_v55 }
 0x851   :  { %v3223_v16 = vsel %vm179_vm2, %v3221_v23, 0.0  ;;  %v3224_v15 = vsel %vm179_vm2, %v3222_v27, 0.0 }
 0x852   :  { %v3225_v28 = vadd.f32 %v3224_v15, %v3223_v16 }
 0x854   :  { %v3226_v7 = vrot.slane %v3225_v28, 4 }
 0x856   :  { %v3227_v29 = vadd.f32 %v3226_v7, %v3225_v28 }
 0x858   :  { %v3228_v30 = vrot.slane %v3227_v29, 2 }
 0x85a   :  { %v3229_v32 = vadd.f32 %v3228_v30, %v3227_v29 }
 0x85c   :  { %v3230_v26 = vrot.slane %v3229_v32, 1 }
 0x85e   :  { %v3231_v17 = vadd.f32 %v3230_v26, %v3229_v32 }
 0x860   :  { %v3232_v25 = vmul.f32 0.0625, %v3231_v17 }
 0x862   :  { %v3233_v21 = vadd.f32 1e-05, %v3232_v25 }
 0x864   :  { %7011 = vrsqrt.f32 %v3233_v21 }
 0x871   :  { %v7012_v33 = vpop.eup %7011 }
 0x872   :  { %v3235_v31 = vmul.f32 %v7012_v33, %v3219_v22  ;;  %v3236_v35 = vmul.f32 %v7012_v33, %v3220_v55 }
 0x874   :  { %v3243_v39 = vmul.f32 %v6417_v34, %v3235_v31  ;;  %v3244_v40 = vmul.f32 %v6417_v34, %v3236_v35 }
 0x876   :  { %v7723_v41 = vadd.f32 %v6418_v37, %v3243_v39  ;;  %v7725_v42 = vadd.f32 %v6418_v37, %v3244_v40 }
 0x878   :  { %6817 = vmatprep.mubr.msk.f32.mxu0 %vm179_vm2, %v7723_v41  ;;  %6839 = vmatprep.mubr.msk.f32.mxu1 %vm179_vm2, %v7723_v41 }
 0x879   :  { %6818 = vmatmul.mubr.msk.f32.vlgmr.msra.gmra.mxu0 %vm179_vm2, %v7725_v42  ;;  %6840 = vmatmul.mubr.msk.f32.vlgmr.msra.gmra.mxu1 %vm179_vm2, %v7725_v42 }
 0x87a   :  { %6821 = vmatpush3.msra.mxu0 %v6432_v2  ;;  %6828 = vmatprep.mubr.msk.f32.mxu0 %vm179_vm2, %v7723_v41 }
 0x87b   :  { %6822 = vmatprep.subr.mxu0 %v6431_v45  ;;  %6854 = vmatprep.mubr.msk.f32.mxu1 %vm7123_vm3, %v7122_v24 }
 0x87c   :  { %6823 = vmatpush3.msra.mxu0 %v6431_v45 }
 0x87d   :  { %6824 = vmatprep.subr.mxu0 %v6430_v51 }
 0x87e   :  { %6825 = vmatpush3.msra.mxu0 %v6430_v51 }
 0x87f   :  { %6826 = vmatprep.subr.mxu0 %v6429_v46 }
 0x880   :  { %6827 = vmatpush3.msra.mxu0 %v6429_v46 }
 0x881   :  { %6829 = vmatmul.mubr.msk.f32.vlgmr.msra.gmra.mxu0 %vm179_vm2, %v7725_v42  ;;  %6842 = vmatprep.subr.mxu0 %v7122_v24 }
 0x882   :  { %6844 = vmatprep.mubr.msk.f32.mxu0 %vm7123_vm3, %v7122_v24 }
 0x939   :  { %v7753_v48 = vpop.f32.mrf.mxu0  ;;  %v7769_v57 = vpop.f32.mrf.mxu1 }
 0x93b   :  { %v3330_v44 = vpop.f32.mrf.mxu0  ;;  %v7775_v58 = vpop.f32.mrf.mxu1 }
 0x93c   :  { %3341 = vrot.lane.b32.xlu1 %v3330_v44, %s7119_s27 }
 0x941   :  { %v7756_v52 = vpop.f32.mrf.mxu0 }
 0x943   :  { %v3702_v49 = vpop.f32.mrf.mxu0 }
 0x944   :  { %3719 = vrot.lane.b32.xlu1 %v3702_v49, %s7121_s29  ;;  %3713 = vrot.lane.b32.xlu0 %v3702_v49, %s7119_s27 }
 0x948   :  { %3353 = vrot.lane.b32.xlu1 %v3330_v44, %s7120_s28  ;;  %3725 = vrot.lane.b32.xlu0 %v3702_v49, %s7120_s28 }
 0x94c   :  { %3721 = vrot.lane.b32.xlu1 %v7756_v52, %s7121_s29  ;;  %3347 = vrot.lane.b32.xlu0 %v3330_v44, %s7121_s29 }
 0x950   :  { %3343 = vrot.lane.b32.xlu1 %v7753_v48, %s7119_s27  ;;  %3715 = vrot.lane.b32.xlu0 %v7756_v52, %s7119_s27 }
 0x954   :  { %3355 = vrot.lane.b32.xlu1 %v7753_v48, %s7120_s28  ;;  %3727 = vrot.lane.b32.xlu0 %v7756_v52, %s7120_s28 }
 0x958   :  { %4085 = vrot.lane.b32.xlu1 %v7775_v58, %s7119_s27  ;;  %3349 = vrot.lane.b32.xlu0 %v7753_v48, %s7121_s29 }
 0x9ae   :  { %v3342_v59 = vpop.permute.xlu1 %3341 }
 0x9b6   :  { %v3720_v60 = vpop.permute.xlu1 %3719  ;;  %v3714_v61 = vpop.permute.xlu0 %3713 }
 0x9b7   :  { %v3731_v62 = vcombine.low %v3702_v49, %v3720_v60  ;;  %v3732_v63 = vcombine.high %v3702_v49, %v3720_v60 }
 0x9b9   :  { %v3739_v3 = vrot.slane %v3731_v62, %v7324_v38  ;;  %v3746_v4 = vrot.slane %v3732_v63, %v7324_v38 }
 0x9ba   :  { %v3354_v0 = vpop.permute.xlu1 %3353  ;;  %v3726_v53 = vpop.permute.xlu0 %3725 }
 0x9bb   :  { %v3747_v54 = vcombine.low %v3714_v61, %v3726_v53  ;;  %v3748_v56 = vcombine.high %v3714_v61, %v3726_v53  ;;  %v3375_v1 = vcombine.low %v3342_v59, %v3354_v0  ;;  %v3376_v2 = vcombine.high %v3342_v59, %v3354_v0 }
 0x9bd   :  { %v3755_v5 = vrot.slane %v3747_v54, %v7324_v38  ;;  %v3762_v6 = vrot.slane %v3748_v56, %v7324_v38  ;;  %v3383_v11 = vrot.slane %v3375_v1, %v7324_v38  ;;  %v3390_v12 = vrot.slane %v3376_v2, %v7324_v38 }
 0x9be   :  { %v3722_v8 = vpop.permute.xlu1 %3721  ;;  %v3348_v9 = vpop.permute.xlu0 %3347 }
 0x9bf   :  { %v3763_v10 = vcombine.low %v3739_v3, %v3755_v5  ;;  %v3764_v20 = vcombine.high %v3739_v3, %v3755_v5  ;;  %v3779_v36 = vcombine.low %v3746_v4, %v3762_v6  ;;  %v3780_v43 = vcombine.high %v3746_v4, %v3762_v6 }
 0x9c0   :  { %v3359_v13 = vcombine.low %v3330_v44, %v3348_v9  ;;  %v3360_v14 = vcombine.high %v3330_v44, %v3348_v9  ;;  %v3799_v55 = vcombine.low %v7756_v52, %v3722_v8  ;;  %v3800_v23 = vcombine.high %v7756_v52, %v3722_v8 }
 0x9c1   :  { %v3771_v18 = vrot.slane %v3763_v10, %v7326_v47  ;;  %v3778_v19 = vrot.slane %v3764_v20, %v7326_v47  ;;  %v3787_v50 = vrot.slane %v3779_v36, %v7326_v47  ;;  %v3794_v22 = vrot.slane %v3780_v43, %v7326_v47 }
 0x9c2   :  { %v3367_v27 = vrot.slane %v3359_v13, %v7324_v38  ;;  %v3374_v16 = vrot.slane %v3360_v14, %v7324_v38  ;;  %v3344_v15 = vpop.permute.xlu1 %3343  ;;  %v3716_v28 = vpop.permute.xlu0 %3715  ;;  %v3807_v52 = vrot.slane %v3799_v55, %v7324_v38  ;;  %v3814_v49 = vrot.slane %v3800_v23, %v7324_v38 }
 0x9c3   :  { %v3867_v7 = vcombine.low %v3771_v18, %v3778_v19  ;;  %v6435_v29 = vcombine.high %v3771_v18, %v3778_v19  ;;  %v3883_v30 = vcombine.low %v3787_v50, %v3794_v22  ;;  %v6436_v32 = vcombine.high %v3787_v50, %v3794_v22 }
 0x9c4   :  { %v3391_v26 = vcombine.low %v3367_v27, %v3383_v11  ;;  %v3392_v17 = vcombine.high %v3367_v27, %v3383_v11  ;;  %v3407_v25 = vcombine.low %v3374_v16, %v3390_v12  ;;  %v3408_v21 = vcombine.high %v3374_v16, %v3390_v12 }
 0x9c5   :  { %v7796_v33 = vrot.slane %v3867_v7, %v7324_v38  ;;  %v7799_v34 = vrot.slane %v6435_v29, %v7324_v38  ;;  %v7802_v31 = vrot.slane %v3883_v30, %v7324_v38  ;;  %v7805_v35 = vrot.slane %v6436_v32, %v7324_v38 }
 0x9c6   :  { %v3399_v37 = vrot.slane %v3391_v26, %v7326_v47  ;;  %v3406_v39 = vrot.slane %v3392_v17, %v7326_v47  ;;  %v3415_v40 = vrot.slane %v3407_v25, %v7326_v47  ;;  %v3422_v45 = vrot.slane %v3408_v21, %v7326_v47  ;;  %v3356_v51 = vpop.permute.xlu1 %3355  ;;  %v3728_v46 = vpop.permute.xlu0 %3727 }
 0x9c7   :  { %v3899_v44 = vcombine.low %v7796_v33, %v7799_v34  ;;  %v3443_v63 = vcombine.low %v3344_v15, %v3356_v51  ;;  %v3444_v0 = vcombine.high %v3344_v15, %v3356_v51  ;;  %v3815_v53 = vcombine.low %v3716_v28, %v3728_v46 }
 0x9c8   :  { %v3495_v59 = vcombine.low %v3399_v37, %v3406_v39  ;;  %v6425_v60 = vcombine.high %v3399_v37, %v3406_v39  ;;  %v3511_v61 = vcombine.low %v3415_v40, %v3422_v45  ;;  %v6426_v62 = vcombine.high %v3415_v40, %v3422_v45 }
 0x9c9   :  { %v3816_v54 = vcombine.high %v3716_v28, %v3728_v46  ;;  %v3900_v56 = vcombine.high %v7796_v33, %v7799_v34  ;;  %v3915_v1 = vcombine.low %v7802_v31, %v7805_v35  ;;  %v3916_v4 = vcombine.high %v7802_v31, %v7805_v35 }
 0x9ca   :  { %v7820_v2 = vrot.slane %v3495_v59, %v7324_v38  ;;  %v7823_v3 = vrot.slane %v6425_v60, %v7324_v38  ;;  %v3518_v5 = vrot.slane %v3511_v61, %v7324_v38  ;;  %v3823_v6 = vrot.slane %v3815_v53, %v7324_v38  ;;  %v3350_v9 = vpop.permute.xlu0 %3349 }
 0x9cb   :  { %v3830_v8 = vrot.slane %v3816_v54, %v7324_v38  ;;  %v3526_v10 = vrot.slane %v6426_v62, %v7324_v38  ;;  %v3451_v36 = vrot.slane %v3443_v63, %v7324_v38  ;;  %v3458_v43 = vrot.slane %v3444_v0, %v7324_v38 }
 0x9cc   :  { %v3527_v20 = vcombine.low %v7820_v2, %v7823_v3  ;;  %v3831_v11 = vcombine.low %v3807_v52, %v3823_v6  ;;  %v3832_v12 = vcombine.high %v3807_v52, %v3823_v6  ;;  %v3427_v18 = vcombine.low %v7753_v48, %v3350_v9 }
 0x9cd   :  { %v3847_v13 = vcombine.low %v3814_v49, %v3830_v8  ;;  %v3848_v14 = vcombine.high %v3814_v49, %v3830_v8  ;;  %v3428_v19 = vcombine.high %v7753_v48, %v3350_v9  ;;  %v3907_v50 = vrot.slane %v3899_v44, %v7326_v47 }
 0x9ce   :  { %v3923_v22 = vrot.slane %v3915_v1, %v7326_v47  ;;  %v3839_v55 = vrot.slane %v3831_v11, %v7326_v47  ;;  %v3846_v23 = vrot.slane %v3832_v12, %v7326_v47  ;;  %v3543_v15 = vcombine.low %v3518_v5, %v3526_v10 }
 0x9cf   :  { %v3855_v27 = vrot.slane %v3847_v13, %v7326_v47  ;;  %v3862_v16 = vrot.slane %v3848_v14, %v7326_v47  ;;  %v3435_v28 = vrot.slane %v3427_v18, %v7324_v38  ;;  %v3442_v7 = vrot.slane %v3428_v19, %v7324_v38 }
 0x9d0   :  { %v3931_v29 = vcombine.low %v3907_v50, %v3923_v22  ;;  %v3935_v30 = vcombine.low %v3839_v55, %v3846_v23  ;;  %v6437_v48 = vcombine.high %v3839_v55, %v3846_v23  ;;  %v3528_v46 = vcombine.high %v7820_v2, %v7823_v3 }
 0x9d1   :  { %v3951_v32 = vcombine.low %v3855_v27, %v3862_v16  ;;  %v6438_v26 = vcombine.high %v3855_v27, %v3862_v16  ;;  %v3459_v17 = vcombine.low %v3435_v28, %v3451_v36  ;;  %v3460_v25 = vcombine.high %v3435_v28, %v3451_v36 }
 0x9d2   :  { %v3475_v21 = vcombine.low %v3442_v7, %v3458_v43  ;;  %v3476_v33 = vcombine.high %v3442_v7, %v3458_v43  ;;  %6843 = vmatpush3.xpose.msk.msra.mxu0 %vm1295_vm4, %v3931_v29  ;;  %v3942_v34 = vrot.slane %v3935_v30, %v7324_v38  ;;  %v3950_v31 = vrot.slane %v6437_v48, %v7324_v38 }
 0x9d3   :  { %v3958_v35 = vrot.slane %v3951_v32, %v7324_v38  ;;  %v3966_v37 = vrot.slane %v6438_v26, %v7324_v38  ;;  %6847 = vmatprep.subr.mxu0 %v7122_v24  ;;  %v3467_v39 = vrot.slane %v3459_v17, %v7326_v47  ;;  %v3474_v40 = vrot.slane %v3460_v25, %v7326_v47 }
 0x9d4   :  { %v3483_v45 = vrot.slane %v3475_v21, %v7326_v47  ;;  %v3490_v51 = vrot.slane %v3476_v33, %v7326_v47  ;;  %v3544_v44 = vcombine.high %v3518_v5, %v3526_v10  ;;  %v3967_v52 = vcombine.low %v3942_v34, %v3950_v31 }
 0x9d5   :  { %v3914_v49 = vrot.slane %v3900_v56, %v7326_v47  ;;  %v3563_v59 = vcombine.low %v3467_v39, %v3474_v40  ;;  %v6427_v60 = vcombine.high %v3467_v39, %v3474_v40  ;;  %v3983_v63 = vcombine.low %v3958_v35, %v3966_v37 }
 0x9d6   :  { %v3579_v61 = vcombine.low %v3483_v45, %v3490_v51  ;;  %v6428_v62 = vcombine.high %v3483_v45, %v3490_v51  ;;  %v3930_v0 = vrot.slane %v3916_v4, %v7326_v47  ;;  %v3535_v53 = vrot.slane %v3527_v20, %v7326_v47 }
 0x9d7   :  { %v3551_v54 = vrot.slane %v3543_v15, %v7326_v47  ;;  %v3570_v1 = vrot.slane %v3563_v59, %v7324_v38  ;;  %v3578_v6 = vrot.slane %v6427_v60, %v7324_v38  ;;  %v3542_v8 = vrot.slane %v3528_v46, %v7326_v47 }
 0x9d8   :  { %v3586_v2 = vrot.slane %v3579_v61, %v7324_v38  ;;  %v3594_v3 = vrot.slane %v6428_v62, %v7324_v38  ;;  %v3933_v56 = vcombine.low %v3914_v49, %v3930_v0  ;;  %v3558_v9 = vrot.slane %v3544_v44, %v7326_v47 }
 0x9d9   :  { %v3559_v5 = vcombine.low %v3535_v53, %v3551_v54  ;;  %v3595_v10 = vcombine.low %v3570_v1, %v3578_v6  ;;  %v3932_v36 = vcombine.high %v3907_v50, %v3923_v22  ;;  %v3968_v20 = vcombine.high %v3942_v34, %v3950_v31 }
 0x9da   :  { %v3611_v4 = vcombine.low %v3586_v2, %v3594_v3  ;;  %6853 = vmatpush3.xpose.msk.msra.mxu1 %vm1295_vm4, %v3933_v56  ;;  %v3561_v43 = vcombine.low %v3542_v8, %v3558_v9  ;;  %v3984_v11 = vcombine.high %v3958_v35, %v3966_v37  ;;  %v3975_v12 = vrot.slane %v3967_v52, %v7326_v47 }
 0x9db   :  { %6845 = vmatmul.mubr.msk.f32.vlgmr.msra.gmra.mxu0 %vm1295_vm4, %v3559_v5  ;;  %v3991_v13 = vrot.slane %v3983_v63, %v7326_v47  ;;  %v3560_v14 = vcombine.high %v3535_v53, %v3551_v54  ;;  %6862 = vmatprep.subr.mxu1 %v7122_v24  ;;  %v3603_v18 = vrot.slane %v3595_v10, %v7326_v47 }
 0x9dc   :  { %6848 = vmatpush3.xpose.msk.msra.mxu0 %vm1295_vm4, %v3932_v36  ;;  %6849 = vmatprep.mubr.msk.f32.mxu0 %vm7123_vm3, %v7122_v24  ;;  %v3619_v19 = vrot.slane %v3611_v4, %v7326_v47  ;;  %v3934_v50 = vcombine.high %v3914_v49, %v3930_v0  ;;  %v3596_v55 = vcombine.high %v3570_v1, %v3578_v6 }
 0x9dd   :  { %6857 = vmatprep.subr.mxu0 %v7122_v24  ;;  %6855 = vmatmul.mubr.msk.f32.vlgmr.msra.gmra.mxu1 %vm1295_vm4, %v3561_v43  ;;  %v3999_v22 = vcombine.low %v3975_v12, %v3991_v13  ;;  %v3612_v23 = vcombine.high %v3586_v2, %v3594_v3  ;;  %v4000_v27 = vcombine.high %v3975_v12, %v3991_v13  ;;  %v4086_v2 = vpop.permute.xlu1 %4085 }
 0x9de   :  { %6864 = vmatprep.mubr.msk.f32.mxu1 %vm7123_vm3, %v7122_v24  ;;  %v3982_v16 = vrot.slane %v3968_v20, %v7326_v47  ;;  %v3998_v15 = vrot.slane %v3984_v11, %v7326_v47  ;;  %v3562_v28 = vcombine.high %v3542_v8, %v3558_v9  ;;  %v3627_v7 = vcombine.low %v3603_v18, %v3619_v19 }
 0x9df   :  { %6850 = vmatmul.mubr.msk.f32.vlgmr.msra.gmra.mxu0 %vm1295_vm4, %v3560_v14  ;;  %6863 = vmatpush3.xpose.msk.msra.mxu1 %vm1295_vm4, %v3999_v22  ;;  %v3628_v29 = vcombine.high %v3603_v18, %v3619_v19  ;;  %v3610_v30 = vrot.slane %v3596_v55, %v7326_v47  ;;  %v3626_v48 = vrot.slane %v3612_v23, %v7326_v47 }
 0x9e0   :  { %6858 = vmatpush3.xpose.msk.msra.mxu0 %vm1295_vm4, %v3934_v50  ;;  %6859 = vmatprep.mubr.msk.f32.mxu0 %vm7123_vm3, %v7122_v24  ;;  %v4001_v32 = vcombine.low %v3982_v16, %v3998_v15  ;;  %v4002_v26 = vcombine.high %v3982_v16, %v3998_v15 }
 0x9e1   :  { %6867 = vmatprep.subr.mxu0 %v7122_v24  ;;  %6872 = vmatprep.subr.mxu1 %v7122_v24  ;;  %v3629_v17 = vcombine.low %v3610_v30, %v3626_v48  ;;  %v3630_v25 = vcombine.high %v3610_v30, %v3626_v48 }
 0x9e2   :  { %6865 = vmatmul.mubr.msk.f32.vlgmr.msra.gmra.mxu1 %vm1295_vm4, %v3627_v7 }
 0x9e3   :  { %6860 = vmatmul.mubr.msk.f32.vlgmr.msra.gmra.mxu0 %vm1295_vm4, %v3562_v28  ;;  %6873 = vmatpush3.xpose.msk.msra.mxu1 %vm1295_vm4, %v4001_v32 }
 0x9e4   :  { %6868 = vmatpush3.xpose.msk.msra.mxu0 %vm1295_vm4, %v4000_v27  ;;  %6869 = vmatprep.mubr.msk.f32.mxu0 %vm7123_vm3, %v7122_v24 }
 0x9e5   :  { %6877 = vmatprep.subr.mxu0 %v7122_v24  ;;  %6874 = vmatprep.mubr.msk.f32.mxu1 %vm7123_vm3, %v7122_v24 }
 0x9e6   :  { %6882 = vmatprep.subr.mxu1 %v7122_v24  ;;  %6875 = vmatmul.mubr.msk.f32.vlgmr.msra.gmra.mxu1 %vm1295_vm4, %v3629_v17 }
 0x9e7   :  { %6870 = vmatmul.mubr.msk.f32.vlgmr.msra.gmra.mxu0 %vm1295_vm4, %v3628_v29  ;;  %6884 = vmatprep.mubr.msk.f32.mxu1 %vm7123_vm3, %v7122_v24 }
 0x9e8   :  { %6878 = vmatpush3.xpose.msk.msra.mxu0 %vm1295_vm4, %v4002_v26  ;;  %6879 = vmatprep.mubr.msk.f32.mxu0 %vm7123_vm3, %v7122_v24 }
 0x9e9   :  { %6887 = vmatprep.subr.mxu0 %v7122_v24 }
 0x9eb   :  { %6880 = vmatmul.mubr.msk.f32.vlgmr.msra.gmra.mxu0 %vm1295_vm4, %v3630_v25 }
 0x9ec   :  { %6889 = vmatprep.mubr.msk.f32.mxu0 %vm7123_vm3, %v7122_v24 }
 0xa9b   :  { %v4447_v21 = vpop.f32.mrf.mxu0 }
 0xa9c   :  { %v4983_v33 = vsel %vm1295_vm4, %v4447_v21, -inf }
 0xa9d   :  { %4984 = vmax.xlane.f32.xlu0 %v4983_v33  ;;  %v6846_v34 = vpop.f32.mrf.mxu0  ;;  %v4599_v31 = vpop.f32.mrf.mxu1 }
 0xa9e   :  { %v4989_v39 = vsel %vm1295_vm4, %v4599_v31, -inf }
 0xa9f   :  { %v4523_v35 = vpop.f32.mrf.mxu0  ;;  %v6856_v37 = vpop.f32.mrf.mxu1 }
 0xaa0   :  { %v4986_v40 = vsel %vm1295_vm4, %v4523_v35, -inf }
 0xaa1   :  { %4990 = vmax.xlane.f32.xlu0 %v4989_v39  ;;  %4987 = vmax.xlane.f32.xlu1 %v4986_v40  ;;  %v6851_v45 = vpop.f32.mrf.mxu0 }
 0xaa2   :  { %v4751_v52 = vpop.f32.mrf.mxu1 }
 0xaa3   :  { %v4675_v51 = vpop.f32.mrf.mxu0  ;;  %v4995_v49 = vsel %vm1295_vm4, %v4751_v52, -inf }
 0xaa4   :  { %v4992_v46 = vsel %vm1295_vm4, %v4675_v51, -inf  ;;  %v6866_v60 = vpop.f32.mrf.mxu1 }
 0xaa5   :  { %4993 = vmax.xlane.f32.xlu0 %v4992_v46  ;;  %v6861_v44 = vpop.f32.mrf.mxu0  ;;  %4996 = vmax.xlane.f32.xlu1 %v4995_v49 }
 0xaa6   :  { %v4903_v63 = vpop.f32.mrf.mxu1 }
 0xaa7   :  { %v4827_v59 = vpop.f32.mrf.mxu0  ;;  %v5001_v0 = vsel %vm1295_vm4, %v4903_v63, -inf }
 0xaa8   :  { %v4998_v61 = vsel %vm1295_vm4, %v4827_v59, -inf  ;;  %v6876_v54 = vpop.f32.mrf.mxu1 }
 0xaa9   :  { %4999 = vmax.xlane.f32.xlu0 %v4998_v61  ;;  %v6871_v62 = vpop.f32.mrf.mxu0  ;;  %5002 = vmax.xlane.f32.xlu1 %v5001_v0 }
 0xaab   :  { %v4979_v53 = vpop.f32.mrf.mxu0 }
 0xaac   :  { %v5004_v1 = vsel %vm1295_vm4, %v4979_v53, -inf }
 0xaad   :  { %5005 = vmax.xlane.f32.xlu0 %v5004_v1  ;;  %v6881_v6 = vpop.f32.mrf.mxu0 }
 0xaba   :  { %4097 = vrot.lane.b32.xlu1 %v7775_v58, %s7120_s28 }
 0xac3   :  { %4091 = vrot.lane.b32.xlu0 %v7775_v58, %s7121_s29 }
 0xb26   :  { %v4985_v3 = vpop.xlane.xlu0 %4984 }
 0xb27   :  { %v5007_v56 = vsub.f32 %v4447_v21, %v4985_v3 }
 0xb29   :  { %v5015_v5 = vmul.f32 1.442695, %v5007_v56 }
 0xb2a   :  { %v4988_v8 = vpop.xlane.xlu1 %4987  ;;  %v4991_v9 = vpop.xlane.xlu0 %4990 }
 0xb2b   :  { %7013 = vpow2.f32 %v5015_v5  ;;  %v5008_v10 = vsub.f32 %v4523_v35, %v4988_v8  ;;  %v5009_v4 = vsub.f32 %v4599_v31, %v4991_v9 }
 0xb2d   :  { %v5017_v36 = vmul.f32 1.442695, %v5008_v10  ;;  %v5019_v20 = vmul.f32 1.442695, %v5009_v4 }
 0xb2e   :  { %v4994_v43 = vpop.xlane.xlu0 %4993  ;;  %v4997_v12 = vpop.xlane.xlu1 %4996 }
 0xb2f   :  { %7015 = vpow2.f32 %v5017_v36  ;;  %v5010_v11 = vsub.f32 %v4675_v51, %v4994_v43  ;;  %v5011_v14 = vsub.f32 %v4751_v52, %v4997_v12 }
 0xb30   :  { %7017 = vpow2.f32 %v5019_v20 }
 0xb31   :  { %v5021_v13 = vmul.f32 1.442695, %v5010_v11  ;;  %v5023_v19 = vmul.f32 1.442695, %v5011_v14 }
 0xb32   :  { %v5000_v18 = vpop.xlane.xlu0 %4999  ;;  %v5003_v22 = vpop.xlane.xlu1 %5002 }
 0xb33   :  { %7019 = vpow2.f32 %v5021_v13  ;;  %v5012_v50 = vsub.f32 %v4827_v59, %v5000_v18  ;;  %v5013_v23 = vsub.f32 %v4903_v63, %v5003_v22 }
 0xb34   :  { %7021 = vpow2.f32 %v5023_v19 }
 0xb35   :  { %v5025_v55 = vmul.f32 1.442695, %v5012_v50  ;;  %v5027_v16 = vmul.f32 1.442695, %v5013_v23 }
 0xb36   :  { %v5006_v27 = vpop.xlane.xlu0 %5005  ;;  %v4098_v7 = vpop.permute.xlu1 %4097 }
 0xb37   :  { %7023 = vpow2.f32 %v5025_v55  ;;  %v5014_v15 = vsub.f32 %v4979_v53, %v5006_v27  ;;  %v4119_v30 = vcombine.low %v4086_v2, %v4098_v7  ;;  %v4120_v48 = vcombine.high %v4086_v2, %v4098_v7 }
 0xb38   :  { %v7925_v28 = vpop.eup %7013  ;;  %7025 = vpow2.f32 %v5027_v16 }
 0xb39   :  { %v5029_v29 = vmul.f32 1.442695, %v5014_v15  ;;  %v5031_v32 = vsel %vm1295_vm4, %v7925_v28, 0.0  ;;  %v4127_v17 = vrot.slane %v4119_v30, %v7324_v38  ;;  %v4134_v33 = vrot.slane %v4120_v48, %v7324_v38 }
 0xb3a   :  { %v4092_v26 = vpop.permute.xlu0 %4091  ;;  %5032 = vadd.xlane.f32.xlu1 %v5031_v32 }
 0xb3b   :  { %7027 = vpow2.f32 %v5029_v29  ;;  %v4103_v25 = vcombine.low %v7775_v58, %v4092_v26  ;;  %v4104_v34 = vcombine.high %v7775_v58, %v4092_v26 }
 0xb3c   :  { %v7931_v21 = vpop.eup %7015 }
 0xb3d   :  { %v7935_v31 = vpop.eup %7017  ;;  %v4111_v35 = vrot.slane %v4103_v25, %v7324_v38  ;;  %v5034_v37 = vsel %vm1295_vm4, %v7931_v21, 0.0  ;;  %v4118_v39 = vrot.slane %v4104_v34, %v7324_v38 }
 0xb3e   :  { %5035 = vadd.xlane.f32.xlu0 %v5034_v37  ;;  %v5037_v40 = vsel %vm1295_vm4, %v7935_v31, 0.0 }
 0xb3f   :  { %v4135_v45 = vcombine.low %v4111_v35, %v4127_v17  ;;  %v4136_v51 = vcombine.high %v4111_v35, %v4127_v17  ;;  %5038 = vadd.xlane.f32.xlu1 %v5037_v40  ;;  %v4151_v44 = vcombine.low %v4118_v39, %v4134_v33  ;;  %v4152_v58 = vcombine.high %v4118_v39, %v4134_v33 }
 0xb40   :  { %v7943_v46 = vpop.eup %7019 }
 0xb41   :  { %v4143_v52 = vrot.slane %v4135_v45, %v7326_v47  ;;  %v4150_v49 = vrot.slane %v4136_v51, %v7326_v47  ;;  %v5040_v59 = vsel %vm1295_vm4, %v7943_v46, 0.0  ;;  %v7949_v60 = vpop.eup %7021  ;;  %v4159_v61 = vrot.slane %v4151_v44, %v7326_v47 }
 0xb42   :  { %v4166_v62 = vrot.slane %v4152_v58, %v7326_v47  ;;  %5041 = vadd.xlane.f32.xlu0 %v5040_v59  ;;  %v5043_v53 = vsel %vm1295_vm4, %v7949_v60, 0.0 }
 0xb43   :  { %v4239_v63 = vcombine.low %v4143_v52, %v4150_v49  ;;  %v6445_v0 = vcombine.high %v4143_v52, %v4150_v49  ;;  %5044 = vadd.xlane.f32.xlu1 %v5043_v53 }
 0xb44   :  { %v7955_v54 = vpop.eup %7023  ;;  %v4255_v1 = vcombine.low %v4159_v61, %v4166_v62  ;;  %v6446_v6 = vcombine.high %v4159_v61, %v4166_v62 }
 0xb45   :  { %v4246_v2 = vrot.slane %v4239_v63, %v7324_v38  ;;  %v4254_v3 = vrot.slane %v6445_v0, %v7324_v38  ;;  %v5046_v56 = vsel %vm1295_vm4, %v7955_v54, 0.0  ;;  %v7961_v5 = vpop.eup %7025 }
 0xb46   :  { %v4262_v8 = vrot.slane %v4255_v1, %v7324_v38  ;;  %v4270_v9 = vrot.slane %v6446_v6, %v7324_v38  ;;  %5047 = vadd.xlane.f32.xlu0 %v5046_v56  ;;  %v5049_v10 = vsel %vm1295_vm4, %v7961_v5, 0.0 }
 0xb47   :  { %v4271_v4 = vcombine.low %v4246_v2, %v4254_v3  ;;  %v4272_v36 = vcombine.high %v4246_v2, %v4254_v3  ;;  %5050 = vadd.xlane.f32.xlu1 %v5049_v10 }
 0xb48   :  { %v7967_v20 = vpop.eup %7027  ;;  %v4287_v43 = vcombine.low %v4262_v8, %v4270_v9  ;;  %v4288_v11 = vcombine.high %v4262_v8, %v4270_v9 }
 0xb49   :  { %v5052_v12 = vsel %vm1295_vm4, %v7967_v20, 0.0  ;;  %v4279_v13 = vrot.slane %v4271_v4, %v7326_v47  ;;  %v4286_v14 = vrot.slane %v4272_v36, %v7326_v47 }
 0xb4a   :  { %5053 = vadd.xlane.f32.xlu0 %v5052_v12  ;;  %v4295_v18 = vrot.slane %v4287_v43, %v7326_v47  ;;  %v4302_v19 = vrot.slane %v4288_v11, %v7326_v47 }
 0xb4c   :  { %v4303_v50 = vcombine.low %v4279_v13, %v4295_v18  ;;  %v4304_v22 = vcombine.high %v4279_v13, %v4295_v18  ;;  %v4305_v55 = vcombine.low %v4286_v14, %v4302_v19  ;;  %v4306_v23 = vcombine.high %v4286_v14, %v4302_v19 }
 0xb4e   :  { %6883 = vmatpush3.msra.mxu1 %v4303_v50  ;;  %6888 = vmatpush3.msra.mxu0 %v4304_v22 }
 0xb4f   :  { %6892 = vmatprep.subr.mxu1 %v7122_v24  ;;  %6897 = vmatprep.subr.mxu0 %v7122_v24 }
 0xb58   :  { %4093 = vrot.lane.b32.xlu1 %v7769_v57, %s7121_s29 }
 0xb5c   :  { %4099 = vrot.lane.b32.xlu1 %v7769_v57, %s7120_s28  ;;  %s7128_s28 = smov [#allocation7]  }
 0xb5d   :  { %s6344_s29 = sshll.u32 %s7128_s28, 4  ;;  %s6345_s29 = int_to_ptr.vmem [resolvable:$true] %s6344_s29 }
 0xb5e   :  { %p7094_p11 = scmp.lt.s32.totalorder %s6345_s29, %s6345_s29 }
 0xb60   :  { %4087 = vrot.lane.b32.xlu0 %v7769_v57, %s7119_s27 }
 0xbc3   :  { %v5033_v27 = vpop.xlane.xlu1 %5032 }
 0xbc4   :  { %7029 = vrcp.f32 %v5033_v27 }
 0xbc7   :  { %v5036_v16 = vpop.xlane.xlu0 %5035 }
 0xbc8   :  { %v5039_v15 = vpop.xlane.xlu1 %5038  ;;  %7031 = vrcp.f32 %v5036_v16 }
 0xbc9   :  { %7033 = vrcp.f32 %v5039_v15 }
 0xbcb   :  { %v5042_v7 = vpop.xlane.xlu0 %5041 }
 0xbcc   :  { %7035 = vrcp.f32 %v5042_v7  ;;  %v5045_v29 = vpop.xlane.xlu1 %5044 }
 0xbcd   :  { %7037 = vrcp.f32 %v5045_v29 }
 0xbcf   :  { %v5048_v30 = vpop.xlane.xlu0 %5047 }
 0xbd0   :  { %v5051_v48 = vpop.xlane.xlu1 %5050  ;;  %7039 = vrcp.f32 %v5048_v30 }
 0xbd1   :  { %v7030_v32 = vpop.eup %7029  ;;  %7041 = vrcp.f32 %v5051_v48 }
 0xbd2   :  { %v5056_v17 = vmul.f32 %v7030_v32, %v7925_v28 }
 0xbd3   :  { %v5054_v26 = vpop.xlane.xlu0 %5053 }
 0xbd4   :  { %6885 = vmatmul.mubr.msk.f32.vlgmr.msra.gmra.mxu1 %vm1295_vm4, %v5056_v17  ;;  %v4094_v33 = vpop.permute.xlu1 %4093  ;;  %7043 = vrcp.f32 %v5054_v26 }
 0xbd5   :  { %v7032_v25 = vpop.eup %7031  ;;  %6893 = vmatpush3.msra.mxu1 %v4305_v55  ;;  %6894 = vmatprep.mubr.msk.f32.mxu1 %vm7123_vm3, %v7122_v24  ;;  %v4171_v39 = vcombine.low %v7769_v57, %v4094_v33  ;;  %v4172_v40 = vcombine.high %v7769_v57, %v4094_v33 }
 0xbd6   :  { %v7034_v34 = vpop.eup %7033  ;;  %v5058_v35 = vmul.f32 %v7032_v25, %v7931_v21  ;;  %6902 = vmatprep.subr.mxu1 %v7122_v24 }
 0xbd7   :  { %v5060_v37 = vmul.f32 %v7034_v34, %v7935_v31  ;;  %v4088_v45 = vpop.permute.xlu0 %4087  ;;  %v4179_v57 = vrot.slane %v4171_v39, %v7324_v38  ;;  %v4186_v31 = vrot.slane %v4172_v40, %v7324_v38 }
 0xbd8   :  { %6890 = vmatmul.mubr.msk.f32.vlgmr.msra.gmra.mxu0 %vm1295_vm4, %v5058_v35  ;;  %v4100_v51 = vpop.permute.xlu1 %4099 }
 0xbd9   :  { %v7036_v28 = vpop.eup %7035  ;;  %6895 = vmatmul.mubr.msk.f32.vlgmr.msra.gmra.mxu1 %vm1295_vm4, %v5060_v37  ;;  %6898 = vmatpush3.msra.mxu0 %v4306_v23  ;;  %v4187_v44 = vcombine.low %v4088_v45, %v4100_v51  ;;  %v4188_v58 = vcombine.high %v4088_v45, %v4100_v51 }
 0xbda   :  { %6899 = vmatprep.mubr.msk.f32.mxu0 %vm7123_vm3, %v7122_v24  ;;  %v5062_v21 = vmul.f32 %v7036_v28, %v7943_v46  ;;  %6907 = vmatprep.subr.mxu0 %v7122_v24  ;;  %v7038_v13 = vpop.eup %7037 }
 0xbdb   :  { %6904 = vmatprep.mubr.msk.f32.mxu1 %vm7123_vm3, %v7122_v24  ;;  %v4195_v52 = vrot.slane %v4187_v44, %v7324_v38  ;;  %v4202_v49 = vrot.slane %v4188_v58, %v7324_v38  ;;  %v5064_v16 = vmul.f32 %v7038_v13, %v7949_v60 }
 0xbdc   :  { %6900 = vmatmul.mubr.msk.f32.vlgmr.msra.gmra.mxu0 %vm1295_vm4, %v5062_v21 }
 0xbdd   :  { %6909 = vmatprep.mubr.msk.f32.mxu0 %vm7123_vm3, %v7122_v24  ;;  %v4203_v46 = vcombine.low %v4179_v57, %v4195_v52  ;;  %v4204_v59 = vcombine.high %v4179_v57, %v4195_v52  ;;  %v4219_v61 = vcombine.low %v4186_v31, %v4202_v49  ;;  %v4220_v62 = vcombine.high %v4186_v31, %v4202_v49  ;;  %v7040_v14 = vpop.eup %7039 }
 0xbde   :  { %v7042_v55 = vpop.eup %7041  ;;  %v5066_v15 = vmul.f32 %v7040_v14, %v7955_v54 }
 0xbdf   :  { %v4211_v63 = vrot.slane %v4203_v46, %v7326_v47  ;;  %v4218_v0 = vrot.slane %v4204_v59, %v7326_v47  ;;  %v4227_v53 = vrot.slane %v4219_v61, %v7326_v47  ;;  %v4234_v1 = vrot.slane %v4220_v62, %v7326_v47 }
 0xbe0   :  { %v5068_v48 = vmul.f32 %v7042_v55, %v7961_v5 }
 0xbe1   :  { %v4307_v6 = vcombine.low %v4211_v63, %v4218_v0  ;;  %v6447_v2 = vcombine.high %v4211_v63, %v4218_v0  ;;  %v4323_v3 = vcombine.low %v4227_v53, %v4234_v1  ;;  %v6448_v56 = vcombine.high %v4227_v53, %v4234_v1  ;;  %v7044_v7 = vpop.eup %7043 }
 0xbe2   :  { %v5070_v60 = vmul.f32 %v7044_v7, %v7967_v20 }
 0xbe3   :  { %v4314_v8 = vrot.slane %v4307_v6, %v7324_v38  ;;  %v4322_v9 = vrot.slane %v6447_v2, %v7324_v38  ;;  %v4330_v10 = vrot.slane %v4323_v3, %v7324_v38  ;;  %v4338_v4 = vrot.slane %v6448_v56, %v7324_v38 }
 0xbe5   :  { %v4339_v36 = vcombine.low %v4314_v8, %v4322_v9  ;;  %v4355_v43 = vcombine.low %v4330_v10, %v4338_v4  ;;  %v4340_v11 = vcombine.high %v4314_v8, %v4322_v9  ;;  %v4356_v12 = vcombine.high %v4330_v10, %v4338_v4 }
 0xbe7   :  { %v4347_v18 = vrot.slane %v4339_v36, %v7326_v47  ;;  %v4363_v19 = vrot.slane %v4355_v43, %v7326_v47  ;;  %v4354_v50 = vrot.slane %v4340_v11, %v7326_v47  ;;  %v4370_v22 = vrot.slane %v4356_v12, %v7326_v47 }
 0xbe9   :  { %v4371_v23 = vcombine.low %v4347_v18, %v4363_v19  ;;  %v4372_v27 = vcombine.high %v4347_v18, %v4363_v19  ;;  %v4373_v29 = vcombine.low %v4354_v50, %v4370_v22  ;;  %v4374_v30 = vcombine.high %v4354_v50, %v4370_v22 }
 0xbeb   :  { %6903 = vmatpush3.msra.mxu1 %v4371_v23  ;;  %6908 = vmatpush3.msra.mxu0 %v4372_v27 }
 0xbec   :  { %6905 = vmatmul.mubr.msk.f32.vlgmr.msra.gmra.mxu1 %vm1295_vm4, %v5064_v16  ;;  %6910 = vmatmul.mubr.msk.f32.vlgmr.msra.gmra.mxu0 %vm1295_vm4, %v5066_v15 }
 0xbed   :  { %6912 = vmatprep.subr.mxu1 %v7122_v24  ;;  %6917 = vmatprep.subr.mxu0 %v7122_v24 }
 0xbee   :  { %6913 = vmatpush3.msra.mxu1 %v4373_v29  ;;  %6918 = vmatpush3.msra.mxu0 %v4374_v30 }
 0xbef   :  { %6914 = vmatprep.mubr.msk.f32.mxu1 %vm7123_vm3, %v7122_v24  ;;  %6919 = vmatprep.mubr.msk.f32.mxu0 %vm7123_vm3, %v7122_v24 }
 0xbf0   :  { %6915 = vmatmul.mubr.msk.f32.vlgmr.msra.gmra.mxu1 %vm1295_vm4, %v5068_v48  ;;  %6920 = vmatmul.mubr.msk.f32.vlgmr.msra.gmra.mxu0 %vm1295_vm4, %v5070_v60 }
 0xc94   :  { %v5140_v54 = vpop.f32.mrf.mxu1 }
 0xc96   :  { %v6886_v32 = vpop.f32.mrf.mxu1 }
 0xc98   :  { %v5213_v26 = vpop.f32.mrf.mxu0 }
 0xc99   :  { %v5286_v17 = vpop.f32.mrf.mxu1 }
 0xc9a   :  { %v6891_v25 = vpop.f32.mrf.mxu0  ;;  %v5655_v33 = vcombine.low %v5140_v54, %v5286_v17  ;;  %v5656_v34 = vcombine.high %v5140_v54, %v5286_v17 }
 0xc9b   :  { %v6896_v5 = vpop.f32.mrf.mxu1  ;;  %v5961_v25 = vld [vmem:[#allocation2 + $0x38] sm:$0xff] }
 0xc9c   :  { %v5359_v35 = vpop.f32.mrf.mxu0  ;;  %v5663_v40 = vrot.slane %v5655_v33, %v7324_v38  ;;  %v5670_v24 = vrot.slane %v5656_v34, %v7324_v38  ;;  %v5960_v33 = vld [vmem:[#allocation2 + $0x30] sm:$0xff]  ;;  %6922 = vmatprep.subr.mxu1 %v5961_v25 }
 0xc9d   :  { %v5671_v20 = vcombine.low %v5213_v26, %v5359_v35  ;;  %v5672_v37 = vcombine.high %v5213_v26, %v5359_v35  ;;  %6923 = vmatpush3.msra.mxu1 %v5961_v25 }
 0xc9e   :  { %v6901_v39 = vpop.f32.mrf.mxu0  ;;  %6924 = vmatprep.subr.mxu1 %v5960_v33 }
 0xc9f   :  { %v5679_v28 = vrot.slane %v5671_v20, %v7324_v38  ;;  %v5686_v45 = vrot.slane %v5672_v37, %v7324_v38  ;;  %6925 = vmatpush3.msra.mxu1 %v5960_v33 }
 0xca1   :  { %v5687_v51 = vcombine.low %v5663_v40, %v5679_v28  ;;  %v5688_v44 = vcombine.high %v5663_v40, %v5679_v28  ;;  %v5703_v58 = vcombine.low %v5670_v24, %v5686_v45  ;;  %v5704_v21 = vcombine.high %v5670_v24, %v5686_v45  ;;  %v5959_v28 = vld [vmem:[#allocation2 + $0x28] sm:$0xff]  ;;  %v5958_v45 = vld [vmem:[#allocation2 + $0x20] sm:$0xff] }
 0xca2   :  { %6926 = vmatprep.subr.mxu1 %v5959_v28 }
 0xca3   :  { %v5695_v57 = vrot.slane %v5687_v51, %v7326_v47  ;;  %v5702_v31 = vrot.slane %v5688_v44, %v7326_v47  ;;  %v5711_v52 = vrot.slane %v5703_v58, %v7326_v47  ;;  %v5718_v49 = vrot.slane %v5704_v21, %v7326_v47  ;;  %6927 = vmatpush3.msra.mxu1 %v5959_v28 }
 0xca4   :  { %6928 = vmatprep.subr.mxu1 %v5958_v45 }
 0xca5   :  { %v5791_v46 = vcombine.low %v5695_v57, %v5702_v31  ;;  %v6473_v59 = vcombine.high %v5695_v57, %v5702_v31  ;;  %v5807_v61 = vcombine.low %v5711_v52, %v5718_v49  ;;  %v6474_v62 = vcombine.high %v5711_v52, %v5718_v49  ;;  %6929 = vmatpush3.msra.mxu1 %v5958_v45 }
 0xca7   :  { %v5798_v63 = vrot.slane %v5791_v46, %v7324_v38  ;;  %v5806_v0 = vrot.slane %v6473_v59, %v7324_v38  ;;  %v5814_v53 = vrot.slane %v5807_v61, %v7324_v38  ;;  %v5822_v1 = vrot.slane %v6474_v62, %v7324_v38 }
 0xca9   :  { %v5823_v6 = vcombine.low %v5798_v63, %v5806_v0  ;;  %v5839_v2 = vcombine.low %v5814_v53, %v5822_v1  ;;  %v5824_v3 = vcombine.high %v5798_v63, %v5806_v0  ;;  %v5840_v56 = vcombine.high %v5814_v53, %v5822_v1 }
 0xcab   :  { %v8046_v8 = vrot.slane %v5823_v6, %v7326_v47  ;;  %v8049_v9 = vrot.slane %v5839_v2, %v7326_v47  ;;  %v5838_v11 = vrot.slane %v5824_v3, %v7326_v47  ;;  %v5854_v12 = vrot.slane %v5840_v56, %v7326_v47 }
 0xcac   :  { %v5432_v36 = vpop.f32.mrf.mxu1  ;;  %v5505_v43 = vpop.f32.mrf.mxu0 }
 0xcad   :  { %v5856_v10 = vcombine.high %v8046_v8, %v8049_v9  ;;  %v5855_v4 = vcombine.low %v8046_v8, %v8049_v9  ;;  %v5857_v18 = vcombine.low %v5838_v11, %v5854_v12  ;;  %v5858_v60 = vcombine.high %v5838_v11, %v5854_v12  ;;  %v6097_v8 = vld [vmem:[#allocation5 + $0x38] sm:$0xff]  ;;  %v6096_v9 = vld [vmem:[#allocation5 + $0x30] sm:$0xff] }
 0xcae   :  { %v6906_v13 = vpop.f32.mrf.mxu1  ;;  %v6911_v14 = vpop.f32.mrf.mxu0  ;;  %6933 = vmatprep.subr.mxu0 %v6097_v8 }
 0xcaf   :  { %5929 = vrot.lane.b32.xlu0 %v5856_v10, %s7117_s22  ;;  %6934 = vmatpush3.msra.mxu0 %v6097_v8  ;;  %v6094_v14 = vld [vmem:[#allocation5 + $0x20] sm:$0xff] }
 0xcb0   :  { %v5578_v19 = vpop.f32.mrf.mxu1  ;;  %v5651_v50 = vpop.f32.mrf.mxu0  ;;  %6935 = vmatprep.subr.mxu0 %v6096_v9 }
 0xcb1   :  { %v5723_v22 = vcombine.low %v5432_v36, %v5578_v19  ;;  %v5724_v55 = vcombine.high %v5432_v36, %v5578_v19  ;;  %v5739_v23 = vcombine.low %v5505_v43, %v5651_v50  ;;  %v5740_v27 = vcombine.high %v5505_v43, %v5651_v50  ;;  %6936 = vmatpush3.msra.mxu0 %v6096_v9  ;;  %v6493_v19 = vld [vmem:[%s8165_s11 + $0x70] sm:$0xff]  ;;  %v6492_v50 = vld [vmem:[%s8165_s11 + $0x68] sm:$0xff] }
 0xcb2   :  { %v6916_v16 = vpop.f32.mrf.mxu1  ;;  %v6921_v15 = vpop.f32.mrf.mxu0 }
 0xcb3   :  { %5937 = vrot.lane.b32.xlu0 %v5857_v18, %s7126_s6  ;;  %v5731_v7 = vrot.slane %v5723_v22, %v7324_v38  ;;  %v5738_v29 = vrot.slane %v5724_v55, %v7324_v38  ;;  %v5747_v30 = vrot.slane %v5739_v23, %v7324_v38  ;;  %v5754_v48 = vrot.slane %v5740_v27, %v7324_v38  ;;  %v6494_v18 = vld [vmem:[%s8165_s11 + $0x78] sm:$0xff]  ;;  %v6491_v22 = vld [vmem:[%s8165_s11 + $0x60] sm:$0xff] }
 0xcb4   :  { %6944 = vmatprep.subr.mxu1 %v6494_v18 }
 0xcb5   :  { %v5755_v54 = vcombine.low %v5731_v7, %v5747_v30  ;;  %v5756_v32 = vcombine.high %v5731_v7, %v5747_v30  ;;  %v5771_v26 = vcombine.low %v5738_v29, %v5754_v48  ;;  %v5772_v17 = vcombine.high %v5738_v29, %v5754_v48 }
 0xcb7   :  { %5945 = vrot.lane.b32.xlu0 %v5858_v60, %s7127_s30  ;;  %v5763_v34 = vrot.slane %v5755_v54, %v7326_v47  ;;  %v5770_v5 = vrot.slane %v5756_v32, %v7326_v47  ;;  %v5779_v35 = vrot.slane %v5771_v26, %v7326_v47  ;;  %v5786_v20 = vrot.slane %v5772_v17, %v7326_v47 }
 0xcb9   :  { %v5859_v37 = vcombine.low %v5763_v34, %v5770_v5  ;;  %v6475_v39 = vcombine.high %v5763_v34, %v5770_v5  ;;  %v5875_v40 = vcombine.low %v5779_v35, %v5786_v20  ;;  %v6476_v24 = vcombine.high %v5779_v35, %v5786_v20 }
 0xcbb   :  { %v5866_v51 = vrot.slane %v5859_v37, %v7324_v38  ;;  %v5874_v44 = vrot.slane %v6475_v39, %v7324_v38  ;;  %v5882_v58 = vrot.slane %v5875_v40, %v7324_v38  ;;  %v5890_v21 = vrot.slane %v6476_v24, %v7324_v38 }
 0xcbd   :  { %v5891_v57 = vcombine.low %v5866_v51, %v5874_v44  ;;  %v5907_v31 = vcombine.low %v5882_v58, %v5890_v21  ;;  %v5892_v52 = vcombine.high %v5866_v51, %v5874_v44  ;;  %v5908_v49 = vcombine.high %v5882_v58, %v5890_v21  ;;  %v6481_v58 = vld [vmem:[%s8161_s7 + $0x1] ss:$0 sm:$0xff] }
 0xcbf   :  { %v5899_v46 = vrot.slane %v5891_v57, %v7326_v47  ;;  %v5915_v59 = vrot.slane %v5907_v31, %v7326_v47  ;;  %v5906_v63 = vrot.slane %v5892_v52, %v7326_v47  ;;  %v5922_v0 = vrot.slane %v5908_v49, %v7326_v47  ;;  %v6482_v31 = vld [vmem:[%s8162_s8 + $0x1] ss:$0 sm:$0xff] }
 0xcc1   :  { %v5924_v61 = vcombine.high %v5899_v46, %v5915_v59  ;;  %v5923_v62 = vcombine.low %v5899_v46, %v5915_v59  ;;  %v5925_v38 = vcombine.low %v5906_v63, %v5922_v0  ;;  %v5926_v53 = vcombine.high %v5906_v63, %v5922_v0  ;;  %v6488_v63 = vld [vmem:[%s8165_s11 + $0x48] sm:$0xff]  ;;  %v6487_v0 = vld [vmem:[%s8165_s11 + $0x40] sm:$0xff] }
 0xcc3   :  { %5931 = vrot.lane.b32.xlu1 %v5924_v61, %s7117_s22  ;;  %v6490_v61 = vld [vmem:[%s8165_s11 + $0x58] sm:$0xff] }
 0xcc7   :  { %5939 = vrot.lane.b32.xlu1 %v5925_v38, %s7126_s6  ;;  %v6484_v38 = vld [vmem:[%s8164_s10 + $0x1] ss:$0 sm:$0xff]  ;;  %s7089_s6 = scalar_lea.vmem %s6345_s29, 256 }
 0xcc8   :  { %p7090_p10 = scmp.ne.s32.totalorder %s6345_s29, %s7089_s6  ;;  %p7095_p12 = scmp.lt.s32.totalorder %s7089_s6, %s7089_s6 }
 0xcca   :  { %p7096_p13 = por %p7095_p12, %p7094_p11 }
 0xccb   :  { %5947 = vrot.lane.b32.xlu1 %v5926_v53, %s7127_s30 }
 0xccc   :  { %p7097_p0 = pnand %p7096_p13, %p7090_p10 }
 0xd21   :  { %v5930_v1 = vpop.permute.xlu0 %5929 }
 0xd22   :  { %v5951_v2 = vsel %vm1295_vm4, %v5855_v4, %v5930_v1  ;;  %v6095_v4 = vld [vmem:[#allocation5 + $0x28] sm:$0xff] }
 0xd23   :  { %6937 = vmatprep.subr.mxu0 %v6095_v4 }
 0xd24   :  { %6938 = vmatpush3.msra.mxu0 %v6095_v4 }
 0xd25   :  { %v5938_v6 = vpop.permute.xlu0 %5937  ;;  %6939 = vmatprep.subr.mxu0 %v6094_v14 }
 0xd26   :  { %v5953_v3 = vsel %vm2874_vm5, %v5951_v2, %v5938_v6  ;;  %6940 = vmatpush3.msra.mxu0 %v6094_v14 }
 0xd29   :  { %v5946_v56 = vpop.permute.xlu0 %5945 }
 0xd2a   :  { %v5955_v47 = vsel %vm2877_vm6, %v5953_v3, %v5946_v56 }
 0xd2b   :  { %6930 = vmatprep.mubr.msk.f32.mxu1 %vm179_vm2, %v5955_v47  ;;  %v6496_v47 = vld [vmem:[%s8166_s12 + $0x1] ss:$0 sm:$0xff] }
 0xd35   :  { %v5932_v10 = vpop.permute.xlu1 %5931 }
 0xd36   :  { %v5952_v43 = vsel %vm1295_vm4, %v5923_v62, %v5932_v10  ;;  %v6489_v62 = vld [vmem:[%s8165_s11 + $0x50] sm:$0xff] }
 0xd39   :  { %v5940_v36 = vpop.permute.xlu1 %5939 }
 0xd3a   :  { %v5954_v11 = vsel %vm2874_vm5, %v5952_v43, %v5940_v36 }
 0xd3d   :  { %v5948_v12 = vpop.permute.xlu1 %5947 }
 0xd3e   :  { %v5956_v13 = vsel %vm2877_vm6, %v5954_v11, %v5948_v12 }
 0xd3f   :  { %6931 = vmatmul.mubr.msk.f32.vlgmr.msra.gmra.mxu1 %vm179_vm2, %v5956_v13 }
 0xd40   :  { %6945 = vmatpush3.msra.mxu1 %v6494_v18 }
 0xd41   :  { %6946 = vmatprep.subr.mxu1 %v6493_v19 }
 0xd42   :  { %6947 = vmatpush3.msra.mxu1 %v6493_v19 }
 0xd43   :  { %6948 = vmatprep.subr.mxu1 %v6492_v50 }
 0xd44   :  { %6949 = vmatpush3.msra.mxu1 %v6492_v50 }
 0xd45   :  { %6950 = vmatprep.subr.mxu1 %v6491_v22 }
 0xd46   :  { %6951 = vmatpush3.msra.mxu1 %v6491_v22 }
 0xd47   :  { %6952 = vmatprep.subr.mxu1 %v6490_v61 }
 0xd48   :  { %6953 = vmatpush3.msra.mxu1 %v6490_v61 }
 0xd49   :  { %6954 = vmatprep.subr.mxu1 %v6489_v62 }
 0xd4a   :  { %6955 = vmatpush3.msra.mxu1 %v6489_v62 }
 0xd4b   :  { %6956 = vmatprep.subr.mxu1 %v6488_v63 }
 0xd4c   :  { %6957 = vmatpush3.msra.mxu1 %v6488_v63 }
 0xd4d   :  { %6958 = vmatprep.subr.mxu1 %v6487_v0 }
 0xd4e   :  { %6959 = vmatpush3.msra.mxu1 %v6487_v0 }
 0xdff   :  { %v6932_v55 = vpop.f32.mrf.mxu1 }
 0xe00   :  { %v6044_v23 = vadd.f32 %v6932_v55, %v7725_v42 }
 0xe01   :  { %v6034_v27 = vpop.f32.mrf.mxu1 }
 0xe02   :  { %v6043_v16 = vadd.f32 %v6034_v27, %v7723_v41  ;;  %v6050_v15 = vsel %vm179_vm2, %v6044_v23, 0.0 }
 0xe04   :  { %v6049_v7 = vsel %vm179_vm2, %v6043_v16, 0.0 }
 0xe05   :  { %v6051_v29 = vadd.f32 %v6050_v15, %v6049_v7 }
 0xe07   :  { %v6052_v30 = vrot.slane %v6051_v29, 4 }
 0xe09   :  { %v6053_v48 = vadd.f32 %v6052_v30, %v6051_v29 }
 0xe0b   :  { %v6054_v60 = vrot.slane %v6053_v48, 2 }
 0xe0d   :  { %v6055_v54 = vadd.f32 %v6054_v60, %v6053_v48 }
 0xe0f   :  { %v6056_v32 = vrot.slane %v6055_v54, 1 }
 0xe11   :  { %v6057_v26 = vadd.f32 %v6056_v32, %v6055_v54 }
 0xe13   :  { %v6058_v17 = vmul.f32 0.0625, %v6057_v26 }
 0xe15   :  { %v6059_v25 = vsub.f32 %v6043_v16, %v6058_v17  ;;  %v6060_v33 = vsub.f32 %v6044_v23, %v6058_v17 }
 0xe17   :  { %v6061_v34 = vmul.f32 %v6059_v25, %v6059_v25  ;;  %v6062_v5 = vmul.f32 %v6060_v33, %v6060_v33 }
 0xe19   :  { %v6063_v42 = vsel %vm179_vm2, %v6061_v34, 0.0  ;;  %v6064_v41 = vsel %vm179_vm2, %v6062_v5, 0.0 }
 0xe1a   :  { %v6065_v35 = vadd.f32 %v6064_v41, %v6063_v42  ;;  %v6501_v42 = vld [vmem:[%s8167_s13 + $0x1] ss:$0 sm:$0xff] }
 0xe1c   :  { %v6066_v20 = vrot.slane %v6065_v35, 4 }
 0xe1e   :  { %v6067_v37 = vadd.f32 %v6066_v20, %v6065_v35  ;;  %v6502_v20 = vld [vmem:[%s8168_s14 + $0x1] ss:$0 sm:$0xff] }
 0xe20   :  { %v6068_v39 = vrot.slane %v6067_v37, 2 }
 0xe22   :  { %v6069_v40 = vadd.f32 %v6068_v39, %v6067_v37 }
 0xe24   :  { %v6070_v24 = vrot.slane %v6069_v40, 1 }
 0xe26   :  { %v6071_v28 = vadd.f32 %v6070_v24, %v6069_v40 }
 0xe28   :  { %v6072_v45 = vmul.f32 0.0625, %v6071_v28 }
 0xe2a   :  { %v6073_v51 = vadd.f32 1e-05, %v6072_v45 }
 0xe2c   :  { %7045 = vrsqrt.f32 %v6073_v51 }
 0xe39   :  { %v7046_v44 = vpop.eup %7045 }
 0xe3a   :  { %v6075_v21 = vmul.f32 %v7046_v44, %v6059_v25  ;;  %v6076_v57 = vmul.f32 %v7046_v44, %v6060_v33 }
 0xe3c   :  { %v6083_v52 = vmul.f32 %v6481_v58, %v6075_v21  ;;  %v6084_v49 = vmul.f32 %v6481_v58, %v6076_v57 }
 0xe3e   :  { %v6091_v46 = vadd.f32 %v6482_v31, %v6083_v52  ;;  %v6092_v59 = vadd.f32 %v6482_v31, %v6084_v49 }
 0xe40   :  { %6941 = vmatprep.mubr.msk.f32.mxu0 %vm179_vm2, %v6091_v46 }
 0xe41   :  { %6942 = vmatmul.mubr.msk.f32.vlgmr.msra.gmra.mxu0 %vm179_vm2, %v6092_v59 }
 0xf01   :  { %v6943_v53 = vpop.f32.mrf.mxu0 }
 0xf02   :  { %v6184_v1 = vadd.f32 %v6943_v53, %v6484_v38 }
 0xf03   :  { %v6178_v6 = vpop.f32.mrf.mxu0 }
 0xf04   :  { %v6179_v2 = vadd.f32 %v6484_v38, %v6178_v6  ;;  %v6188_v56 = vmax.f32 %v6184_v1, 0.0 }
 0xf06   :  { %v6187_v3 = vmax.f32 %v6179_v2, 0.0 }
 0xf08   :  { %6960 = vmatprep.mubr.msk.f32.mxu1 %vm3123_vm7, %v6187_v3 }
 0xf09   :  { %6961 = vmatmul.mubr.msk.f32.vlgmr.msra.gmra.mxu1 %vm3123_vm7, %v6188_v56 }
 0xfc9   :  { %v6962_v10 = vpop.f32.mrf.mxu1 }
 0xfca   :  { %v6284_v36 = vadd.f32 %v6962_v10, %v6496_v47 }
 0xfcb   :  { %v6278_v43 = vpop.f32.mrf.mxu1 }
 0xfcc   :  { %v6288_v11 = vadd.f32 %v6284_v36, %v6092_v59  ;;  %v6279_v12 = vadd.f32 %v6496_v47, %v6278_v43 }
 0xfce   :  { %v6287_v13 = vadd.f32 %v6279_v12, %v6091_v46  ;;  %v6294_v8 = vsel %vm179_vm2, %v6288_v11, 0.0 }
 0xfd0   :  { %v6293_v9 = vsel %vm179_vm2, %v6287_v13, 0.0 }
 0xfd1   :  { %v6295_v4 = vadd.f32 %v6294_v8, %v6293_v9 }
 0xfd3   :  { %v6296_v14 = vrot.slane %v6295_v4, 4 }
 0xfd5   :  { %v6297_v18 = vadd.f32 %v6296_v14, %v6295_v4 }
 0xfd7   :  { %v6298_v19 = vrot.slane %v6297_v18, 2 }
 0xfd9   :  { %v6299_v50 = vadd.f32 %v6298_v19, %v6297_v18 }
 0xfdb   :  { %v6300_v22 = vrot.slane %v6299_v50, 1 }
 0xfdd   :  { %v6301_v55 = vadd.f32 %v6300_v22, %v6299_v50 }
 0xfdf   :  { %v6302_v23 = vmul.f32 0.0625, %v6301_v55 }
 0xfe1   :  { %v6303_v27 = vsub.f32 %v6287_v13, %v6302_v23  ;;  %v6304_v16 = vsub.f32 %v6288_v11, %v6302_v23 }
 0xfe3   :  { %v6305_v15 = vmul.f32 %v6303_v27, %v6303_v27  ;;  %v6306_v7 = vmul.f32 %v6304_v16, %v6304_v16 }
 0xfe5   :  { %v6307_v29 = vsel %vm179_vm2, %v6305_v15, 0.0  ;;  %v6308_v30 = vsel %vm179_vm2, %v6306_v7, 0.0 }
 0xfe6   :  { %v6309_v48 = vadd.f32 %v6308_v30, %v6307_v29 }
 0xfe8   :  { %v6310_v60 = vrot.slane %v6309_v48, 4 }
 0xfea   :  { %v6311_v54 = vadd.f32 %v6310_v60, %v6309_v48 }
 0xfec   :  { %v6312_v32 = vrot.slane %v6311_v54, 2 }
 0xfee   :  { %v6313_v26 = vadd.f32 %v6312_v32, %v6311_v54 }
 0xff0   :  { %v6314_v17 = vrot.slane %v6313_v26, 1 }
 0xff2   :  { %v6315_v25 = vadd.f32 %v6314_v17, %v6313_v26 }
 0xff4   :  { %v6316_v33 = vmul.f32 0.0625, %v6315_v25 }
 0xff6   :  { %v6317_v34 = vadd.f32 1e-05, %v6316_v33 }
 0xff8   :  { %7047 = vrsqrt.f32 %v6317_v34 }
0x1005   :  { %v7048_v5 = vpop.eup %7047 }
0x1006   :  { %v6319_v41 = vmul.f32 %v7048_v5, %v6303_v27  ;;  %v6320_v35 = vmul.f32 %v7048_v5, %v6304_v16 }
0x1008   :  { %v6327_v37 = vmul.f32 %v6501_v42, %v6319_v41  ;;  %v6328_v39 = vmul.f32 %v6501_v42, %v6320_v35 }
0x100a   :  { %v6335_v40 = vadd.f32 %v6502_v20, %v6327_v37  ;;  %v6336_v24 = vadd.f32 %v6502_v20, %v6328_v39 }
0x100c   :  { %6337 = vst.msk [vmem:[#allocation7] sm:$0xff] %vm179_vm2, %v6335_v40  ;;  %6338 = vst.msk [vmem:[#allocation7 + $0x8] sm:$0xff] %vm179_vm2, %v6336_v24 }
0x100d   :  { %7100 = shalt.err (!%p7097_p0)
}
0x100e   :  { %6350 = dma.vmem_to_hbm [thread:$0]  %s6345_s29, 256, %s8169_s15, [#allocation4], %s7116_s21, %s7116_s21, %s7117_s22  }
0x100f   :  { %7113 = dma.done.wait [#allocation4], 256  }
0x1010   :  { %7114 = vsyncadd [#allocation4], 4294967040 }
0x1011   :  { %6354 = vsyncpa [#allocation3], 1 }
0x1012   :  { %6355 = vsyncpa [#allocation6], 1 }
0x1013   :  { %6356 = vsyncpa [#allocation4], 1 }

</bundles_post_ra>
